<compile_context>
chip_gen: v5e
topology: v5e:2x2
jax: 0.10.0
libtpu: 0.0.40
codegen_flags: <defaults>
</compile_context>

<pallas_src>
import functools
import math

import jax
import jax.numpy as jnp
from jax.experimental import pallas as pl
from jax.experimental.pallas import tpu as pltpu


def _round_up(x, m):
    return ((x + m - 1) // m) * m


def _pick_row_tile(M):
    # Mem-bound kernel: want big (512-2048 row) tiles for HBM-roofline
    # efficiency, but keep the grid an even count of >=2 steps so v7x's two
    # TensorCores both get work.
    if M <= 4096:
        return max(8, _round_up(pl.cdiv(M, 2), 8))
    steps = pl.cdiv(M, 2048)
    steps += steps % 2                       # even number of grid steps
    return _round_up(pl.cdiv(M, steps), 8)


# ----------------------------------------------------------------------------
# Kernel 1: tiny 1x1 conv (matmul) for the g branch at low resolution
# ----------------------------------------------------------------------------

def _conv1x1_kernel(a_ref, w_ref, o_ref):
    o_ref[...] = jnp.dot(a_ref[...], w_ref[...],
                         preferred_element_type=jnp.float32).astype(o_ref.dtype)


def _conv1x1(a_bf16, w_bf16):
    M, cin = a_bf16.shape
    cout = w_bf16.shape[1]
    tm = min(512, max(8, _round_up(M, 8)))
    return pl.pallas_call(
        _conv1x1_kernel,
        out_shape=jax.ShapeDtypeStruct((M, cout), jnp.float32),
        grid=(pl.cdiv(M, tm),),
        in_specs=[
            pl.BlockSpec((tm, cin), lambda i: (i, 0)),
            pl.BlockSpec((cin, cout), lambda i: (0, 0)),
        ],
        out_specs=pl.BlockSpec((tm, cout), lambda i: (i, 0)),
        compiler_params=pltpu.CompilerParams(
            dimension_semantics=("parallel",)),
    )(a_bf16, w_bf16)


# ----------------------------------------------------------------------------
# Kernel 2: fused attention gate
#   s   = relu(x @ Wx + g1 + (bx + bg))        (bf16 MXU, f32 accumulate)
#   psi = sigmoid(s @ wpsi + bpsi)             (skinny MXU matmul, EUP sigmoid)
#   out = x * psi
# ----------------------------------------------------------------------------

def _attention_gate_kernel(x_ref, g1_ref, wx_ref, bxg_ref, wpsi_ref, bpsi_ref,
                           o_ref):
    x16 = x_ref[...]                                        # (tm, xc) bf16
    x1 = jnp.dot(x16, wx_ref[...], preferred_element_type=jnp.float32)
    s = jnp.maximum(x1 + g1_ref[...].astype(jnp.float32) + bxg_ref[...], 0.0)
    z = jnp.dot(s.astype(jnp.bfloat16), wpsi_ref[...],
                preferred_element_type=jnp.float32) + bpsi_ref[0, 0]
    psi = jax.nn.sigmoid(z)                                 # (tm, 1)
    o_ref[...] = (x16.astype(jnp.float32) * psi).astype(o_ref.dtype)


def _fused_attention_gate(x_flat, g1_flat, wx, bxg, wpsi, bpsi):
    M, xc = x_flat.shape
    oc = wx.shape[1]
    tm = _pick_row_tile(M)
    return pl.pallas_call(
        _attention_gate_kernel,
        out_shape=jax.ShapeDtypeStruct((M, xc), jnp.float32),
        grid=(pl.cdiv(M, tm),),
        in_specs=[
            pl.BlockSpec((tm, xc), lambda i: (i, 0)),        # x block (bf16)
            pl.BlockSpec((tm, oc), lambda i: (i, 0)),        # g1 block (bf16)
            pl.BlockSpec((xc, oc), lambda i: (0, 0)),        # Wx (bf16, BN folded)
            pl.BlockSpec((1, oc), lambda i: (0, 0)),         # bx + bg (f32)
            pl.BlockSpec((oc, 1), lambda i: (0, 0)),         # psi weight column (bf16)
            pl.BlockSpec(memory_space=pltpu.MemorySpace.SMEM),  # psi bias scalar
        ],
        out_specs=pl.BlockSpec((tm, xc), lambda i: (i, 0)),
        compiler_params=pltpu.CompilerParams(
            dimension_semantics=("parallel",)),
    )(x_flat, g1_flat, wx, bxg, wpsi, bpsi)


# ----------------------------------------------------------------------------
# XLA glue: bilinear resize (F.interpolate, mode='bilinear', align_corners=False)
# ----------------------------------------------------------------------------

def _bilinear_resize(x, out_h, out_w):
    N, H, W, C = x.shape
    if (out_h, out_w) == (H, W):
        return x

    def coords(o, i):
        s = i / o
        c = (jnp.arange(o, dtype=jnp.float32) + 0.5) * s - 0.5
        return jnp.clip(c, 0.0, i - 1)

    ys = coords(out_h, H)
    xs = coords(out_w, W)
    y0 = jnp.floor(ys).astype(jnp.int32)
    y1 = jnp.minimum(y0 + 1, H - 1)
    wy = (ys - y0.astype(jnp.float32))[None, :, None, None]
    x0 = jnp.floor(xs).astype(jnp.int32)
    x1 = jnp.minimum(x0 + 1, W - 1)
    wx = (xs - x0.astype(jnp.float32))[None, None, :, None]

    top, bot = x[:, y0, :, :], x[:, y1, :, :]
    v = top * (1.0 - wy) + bot * wy
    left, right = v[:, :, x0, :], v[:, :, x1, :]
    return left * (1.0 - wx) + right * wx


# ----------------------------------------------------------------------------
# Parameters (PyTorch layout: 1x1 conv w/ bias + eval-mode BatchNorm)
# ----------------------------------------------------------------------------

def init_attention_gate(key, x_channels, g_channels, out_channels):
    ks = jax.random.split(key, 9)

    def conv_w(k, cin, cout):
        return jax.random.normal(k, (cin, cout), jnp.float32) / math.sqrt(cin)

    def bn(k, c):
        k1, k2, k3, k4 = jax.random.split(k, 4)
        gamma = 1.0 + 0.1 * jax.random.normal(k1, (c,), jnp.float32)
        beta = 0.1 * jax.random.normal(k2, (c,), jnp.float32)
        mean = 0.1 * jax.random.normal(k3, (c,), jnp.float32)
        var = 1.0 + 0.1 * jnp.abs(jax.random.normal(k4, (c,), jnp.float32))
        return gamma, beta, mean, var

    p = {}
    p["wg_w"] = conv_w(ks[0], g_channels, out_channels)
    p["wg_b"] = 0.01 * jax.random.normal(ks[1], (out_channels,), jnp.float32)
    p["wg_gamma"], p["wg_beta"], p["wg_mean"], p["wg_var"] = bn(ks[2], out_channels)
    p["wx_w"] = conv_w(ks[3], x_channels, out_channels)
    p["wx_b"] = 0.01 * jax.random.normal(ks[4], (out_channels,), jnp.float32)
    p["wx_gamma"], p["wx_beta"], p["wx_mean"], p["wx_var"] = bn(ks[5], out_channels)
    p["psi_w"] = conv_w(ks[6], out_channels, 1)
    p["psi_b"] = 0.01 * jax.random.normal(ks[7], (1,), jnp.float32)
    p["psi_gamma"], p["psi_beta"], p["psi_mean"], p["psi_var"] = bn(ks[8], 1)
    return p


def _fold_conv_bn(w, b, gamma, beta, mean, var, eps=1e-5):
    scale = gamma / jnp.sqrt(var + eps)
    return w * scale[None, :], (b - mean) * scale + beta


# ----------------------------------------------------------------------------
# Forward (Pallas) and pure-JAX reference (PyTorch op order, all f32)
# ----------------------------------------------------------------------------

def attention_gate_forward(params, x_nchw, g_nchw):
    x = jnp.transpose(x_nchw, (0, 2, 3, 1)).astype(jnp.float32)   # N,H,W,xc
    g = jnp.transpose(g_nchw, (0, 2, 3, 1)).astype(jnp.float32)   # N,Hg,Wg,gc
    N, H, W, xc = x.shape
    Ng, Hg, Wg, gc = g.shape

    # Fold eval-mode BN into the 1x1 conv weights/biases (trace-time, free).
    wx, bx = _fold_conv_bn(params["wx_w"], params["wx_b"], params["wx_gamma"],
                           params["wx_beta"], params["wx_mean"], params["wx_var"])
    wg, bg = _fold_conv_bn(params["wg_w"], params["wg_b"], params["wg_gamma"],
                           params["wg_beta"], params["wg_mean"], params["wg_var"])
    wp, bp = _fold_conv_bn(params["psi_w"], params["psi_b"], params["psi_gamma"],
                           params["psi_beta"], params["psi_mean"], params["psi_var"])
    oc = wx.shape[1]
    bxg = (bx + bg).reshape(1, oc)           # single fused bias add in-kernel

    # g branch at LOW resolution (cheap direction of the conv/interp
    # commutation): 1x1 conv+BN (bias deferred to bxg) then bilinear resize.
    g1_low = _conv1x1(g.reshape(Ng * Hg * Wg, gc).astype(jnp.bfloat16),
                      wg.astype(jnp.bfloat16)).reshape(Ng, Hg, Wg, oc)
    g1 = _bilinear_resize(g1_low, H, W)

    M = N * H * W
    out = _fused_attention_gate(
        x.reshape(M, xc).astype(jnp.bfloat16),
        g1.reshape(M, oc).astype(jnp.bfloat16),
        wx.astype(jnp.bfloat16),
        bxg,
        wp.reshape(oc, 1).astype(jnp.bfloat16),
        bp.reshape(1, 1))
    return jnp.transpose(out.reshape(N, H, W, xc), (0, 3, 1, 2))


def attention_gate_reference(params, x_nchw, g_nchw):
    hp = jax.lax.Precision.HIGHEST
    x = jnp.transpose(x_nchw, (0, 2, 3, 1)).astype(jnp.float32)
    g = jnp.transpose(g_nchw, (0, 2, 3, 1)).astype(jnp.float32)

    def conv_bn(t, w, b, gamma, beta, mean, var, eps=1e-5):
        y = jnp.einsum("nhwc,co->nhwo", t, w, precision=hp) + b
        return (y - mean) / jnp.sqrt(var + eps) * gamma + beta

    g1 = conv_bn(g, params["wg_w"], params["wg_b"], params["wg_gamma"],
                 params["wg_beta"], params["wg_mean"], params["wg_var"])
    x1 = conv_bn(x, params["wx_w"], params["wx_b"], params["wx_gamma"],
                 params["wx_beta"], params["wx_mean"], params["wx_var"])
    if g1.shape[1:3] != x1.shape[1:3]:
        g1 = _bilinear_resize(g1, x1.shape[1], x1.shape[2])
    s = jnp.maximum(g1 + x1, 0.0)
    psi = conv_bn(s, params["psi_w"], params["psi_b"], params["psi_gamma"],
                  params["psi_beta"], params["psi_mean"], params["psi_var"])
    out = x * jax.nn.sigmoid(psi)
    return jnp.transpose(out, (0, 3, 1, 2))


# ----------------------------------------------------------------------------
# Main
# ----------------------------------------------------------------------------

if __name__ == "__main__":
    B = 2
    X_CHANNELS, G_CHANNELS, OUT_CHANNELS = 128, 256, 128   # lane-dense channels
    H, W = 16, 16          # x (skip connection) resolution
    HG, WG = 8, 8          # g (gating signal) at half resolution, like the UNet

    root = jax.random.PRNGKey(0)
    kp, kx, kg = jax.random.split(root, 3)
    params = init_attention_gate(kp, X_CHANNELS, G_CHANNELS, OUT_CHANNELS)
    x = jax.random.normal(kx, (B, X_CHANNELS, H, W), jnp.float32)
    g = jax.random.normal(kg, (B, G_CHANNELS, HG, WG), jnp.float32)

    fwd = jax.jit(functools.partial(attention_gate_forward, params))
    out = jax.block_until_ready(fwd(x, g))

    assert out.shape == (B, X_CHANNELS, H, W), out.shape
    assert bool(jnp.all(jnp.isfinite(out)))

    ref = jax.block_until_ready(
        jax.jit(functools.partial(attention_gate_reference, params))(x, g))
    err = float(jnp.max(jnp.abs(out.astype(jnp.float32) - ref)))
    # Tolerance sized for bf16 HBM/MXU operands (f32 accumulation) vs the
    # all-f32 HIGHEST-precision reference.
    assert err < 5e-2, f"max abs error vs reference: {err}"

    print("KERNEL_OK")
</pallas_src>

<mosaic_0001>
module attributes {stable_mosaic.version = 11 : i64} {
  func.func @_conv1x1_kernel(%arg0: i32, %arg1: memref<128x256xbf16, #tpu.memory_space<vmem>>, %arg2: memref<256x128xbf16, #tpu.memory_space<vmem>>, %arg3: memref<128x128xf32, #tpu.memory_space<vmem>>) attributes {dimension_semantics = [#tpu.dimension_semantics<parallel>], iteration_bounds = array<i64: 1>, scalar_prefetch = 0 : i64, scratch_operands = 0 : i64, tpu.core_type = #tpu.core_type<tc>, window_params = [{transform_indices = @transform_0, window_bounds = array<i64: 128, 256>}, {pipeline_mode = #tpu.pipeline_mode<synchronous>, transform_indices = @transform_1, window_bounds = array<i64: 256, 128>}, {transform_indices = @transform_2, window_bounds = array<i64: 128, 128>}]} {
    %c0 = arith.constant 0 : index
    %c0_0 = arith.constant 0 : index
    %0 = vector.load %arg1[%c0, %c0_0] : memref<128x256xbf16, #tpu.memory_space<vmem>>, vector<128x256xbf16>
    %c0_1 = arith.constant 0 : index
    %c0_2 = arith.constant 0 : index
    %1 = vector.load %arg2[%c0_1, %c0_2] : memref<256x128xbf16, #tpu.memory_space<vmem>>, vector<256x128xbf16>
    %cst = arith.constant dense<0.000000e+00> : vector<128x128xf32>
    %2 = tpu.matmul %0, %1, %cst {dimension_numbers = #tpu.dot_dimension_numbers<[1], [0], [0], [1], [0, 0, 1, 1], [], []>} : vector<128x256xbf16>, vector<256x128xbf16>, vector<128x128xf32> -> vector<128x128xf32>
    %c0_3 = arith.constant 0 : index
    %c0_4 = arith.constant 0 : index
    %3 = vector.load %arg3[%c0_3, %c0_4] : memref<128x128xf32, #tpu.memory_space<vmem>>, vector<128x128xf32>
    tpu.vector_store %arg3[%c0_3, %c0_4], %2 {strides = array<i32>} : memref<128x128xf32, #tpu.memory_space<vmem>>, vector<128x128xf32>,
    return
  }
  func.func @transform_0(%arg0: i32) -> (i32, i32) {
    %c0_i32 = arith.constant 0 : i32
    %c0_i32_0 = arith.constant 0 : i32
    return %arg0, %c0_i32 : i32, i32
  }
  func.func @transform_1(%arg0: i32) -> (i32, i32) {
    %c0_i32 = arith.constant 0 : i32
    %c0_i32_0 = arith.constant 0 : i32
    %c0_i32_1 = arith.constant 0 : i32
    return %c0_i32, %c0_i32_0 : i32, i32
  }
  func.func @transform_2(%arg0: i32) -> (i32, i32) {
    %c0_i32 = arith.constant 0 : i32
    %c0_i32_0 = arith.constant 0 : i32
    return %arg0, %c0_i32 : i32, i32
  }
}

module attributes {stable_mosaic.version = 11 : i64} {
  func.func @_attention_gate_kernel(%arg0: i32, %arg1: memref<256x128xbf16, #tpu.memory_space<vmem>>, %arg2: memref<256x128xbf16, #tpu.memory_space<vmem>>, %arg3: memref<128x128xbf16, #tpu.memory_space<vmem>>, %arg4: memref<1x128xf32, #tpu.memory_space<vmem>>, %arg5: memref<128x1xbf16, #tpu.memory_space<vmem>>, %arg6: memref<1x1xf32, #tpu.memory_space<smem>>, %arg7: memref<256x128xf32, #tpu.memory_space<vmem>>) attributes {dimension_semantics = [#tpu.dimension_semantics<parallel>], iteration_bounds = array<i64: 2>, scalar_prefetch = 0 : i64, scratch_operands = 0 : i64, tpu.core_type = #tpu.core_type<tc>, window_params = [{transform_indices = @transform_0, window_bounds = array<i64: 256, 128>}, {transform_indices = @transform_1, window_bounds = array<i64: 256, 128>}, {pipeline_mode = #tpu.pipeline_mode<synchronous>, transform_indices = @transform_2, window_bounds = array<i64: 128, 128>}, {pipeline_mode = #tpu.pipeline_mode<synchronous>, transform_indices = @transform_3, window_bounds = array<i64: 1, 128>}, {pipeline_mode = #tpu.pipeline_mode<synchronous>, transform_indices = @transform_4, window_bounds = array<i64: 128, 1>}, {transform_indices = @transform_5, window_bounds = array<i64: 1, 1>}, {transform_indices = @transform_6, window_bounds = array<i64: 256, 128>}]} {
    %c0 = arith.constant 0 : index
    %c0_0 = arith.constant 0 : index
    %0 = vector.load %arg1[%c0, %c0_0] : memref<256x128xbf16, #tpu.memory_space<vmem>>, vector<256x128xbf16>
    %c0_1 = arith.constant 0 : index
    %c0_2 = arith.constant 0 : index
    %1 = vector.load %arg3[%c0_1, %c0_2] : memref<128x128xbf16, #tpu.memory_space<vmem>>, vector<128x128xbf16>
    %cst = arith.constant dense<0.000000e+00> : vector<256x128xf32>
    %2 = tpu.matmul %0, %1, %cst {dimension_numbers = #tpu.dot_dimension_numbers<[1], [0], [0], [1], [0, 0, 1, 1], [], []>} : vector<256x128xbf16>, vector<128x128xbf16>, vector<256x128xf32> -> vector<256x128xf32>
    %c0_3 = arith.constant 0 : index
    %c0_4 = arith.constant 0 : index
    %3 = vector.load %arg2[%c0_3, %c0_4] : memref<256x128xbf16, #tpu.memory_space<vmem>>, vector<256x128xbf16>
    %4 = arith.extf %3 : vector<256x128xbf16> to vector<256x128xf32>
    %5 = arith.addf %2, %4 : vector<256x128xf32>
    %c0_5 = arith.constant 0 : index
    %c0_6 = arith.constant 0 : index
    %6 = vector.load %arg4[%c0_5, %c0_6] : memref<1x128xf32, #tpu.memory_space<vmem>>, vector<1x128xf32>
    %7 = vector.broadcast %6 : vector<1x128xf32> to vector<256x128xf32>
    %8 = arith.addf %5, %7 : vector<256x128xf32>
    %cst_7 = arith.constant 0.000000e+00 : f32
    %9 = vector.broadcast %cst_7 : f32 to vector<256x128xf32>
    %10 = arith.maximumf %8, %9 : vector<256x128xf32>
    %11 = arith.truncf %10 : vector<256x128xf32> to vector<256x128xbf16>
    %c0_8 = arith.constant 0 : index
    %c0_9 = arith.constant 0 : index
    %12 = vector.load %arg5[%c0_8, %c0_9] : memref<128x1xbf16, #tpu.memory_space<vmem>>, vector<128x1xbf16>
    %cst_10 = arith.constant dense<0.000000e+00> : vector<256x1xf32>
    %13 = tpu.matmul %11, %12, %cst_10 {dimension_numbers = #tpu.dot_dimension_numbers<[1], [0], [0], [1], [0, 0, 1, 1], [], []>} : vector<256x128xbf16>, vector<128x1xbf16>, vector<256x1xf32> -> vector<256x1xf32>
    %c0_11 = arith.constant 0 : index
    %c0_12 = arith.constant 0 : index
    %14 = memref.load %arg6[%c0_11, %c0_12] : memref<1x1xf32, #tpu.memory_space<smem>>
    %15 = vector.broadcast %14 : f32 to vector<256x1xf32>
    %16 = arith.addf %13, %15 : vector<256x1xf32>
    %17 = arith.negf %16 : vector<256x1xf32>
    %18 = math.exp %17 : vector<256x1xf32>
    %cst_13 = arith.constant 1.000000e+00 : f32
    %19 = vector.broadcast %cst_13 : f32 to vector<256x1xf32>
    %20 = arith.addf %19, %18 : vector<256x1xf32>
    %21 = arith.divf %19, %20 : vector<256x1xf32>
    %22 = arith.extf %0 : vector<256x128xbf16> to vector<256x128xf32>
    %23 = vector.broadcast %21 : vector<256x1xf32> to vector<256x128xf32>
    %24 = arith.mulf %22, %23 : vector<256x128xf32>
    %c0_14 = arith.constant 0 : index
    %c0_15 = arith.constant 0 : index
    %25 = vector.load %arg7[%c0_14, %c0_15] : memref<256x128xf32, #tpu.memory_space<vmem>>, vector<256x128xf32>
    tpu.vector_store %arg7[%c0_14, %c0_15], %24 {strides = array<i32>} : memref<256x128xf32, #tpu.memory_space<vmem>>, vector<256x128xf32>,
    return
  }
  func.func @transform_0(%arg0: i32) -> (i32, i32) {
    %c0_i32 = arith.constant 0 : i32
    %c0_i32_0 = arith.constant 0 : i32
    return %arg0, %c0_i32 : i32, i32
  }
  func.func @transform_1(%arg0: i32) -> (i32, i32) {
    %c0_i32 = arith.constant 0 : i32
    %c0_i32_0 = arith.constant 0 : i32
    return %arg0, %c0_i32 : i32, i32
  }
  func.func @transform_2(%arg0: i32) -> (i32, i32) {
    %c0_i32 = arith.constant 0 : i32
    %c0_i32_0 = arith.constant 0 : i32
    %c0_i32_1 = arith.constant 0 : i32
    return %c0_i32, %c0_i32_0 : i32, i32
  }
  func.func @transform_3(%arg0: i32) -> (i32, i32) {
    %c0_i32 = arith.constant 0 : i32
    %c0_i32_0 = arith.constant 0 : i32
    %c0_i32_1 = arith.constant 0 : i32
    return %c0_i32, %c0_i32_0 : i32, i32
  }
  func.func @transform_4(%arg0: i32) -> (i32, i32) {
    %c0_i32 = arith.constant 0 : i32
    %c0_i32_0 = arith.constant 0 : i32
    %c0_i32_1 = arith.constant 0 : i32
    return %c0_i32, %c0_i32_0 : i32, i32
  }
  func.func @transform_5(%arg0: i32) -> (i32, i32) {
    %c0_i32 = arith.constant 0 : i32
    %c0_i32_0 = arith.constant 0 : i32
    %c0_i32_1 = arith.constant 0 : i32
    return %c0_i32, %c0_i32_0 : i32, i32
  }
  func.func @transform_6(%arg0: i32) -> (i32, i32) {
    %c0_i32 = arith.constant 0 : i32
    %c0_i32_0 = arith.constant 0 : i32
    return %arg0, %c0_i32 : i32, i32
  }
}

</mosaic_0001>

<bundles_post_ra>
// kernel: attention_gate_forward.2
= control target key start
LH: loop header
LB: loop body
LE: loop exit
PB: predicated region body
PF: predicated region fallthrough
CT: control target
= control target key end

     0   :  { %s736_s1 = inlined_call_operand.vmem [shape: bf16[256,128], index: 1, kind: input, shape index: {}]   ;;  %s737_s0 = inlined_call_operand.vmem [shape: bf16[128,256], index: 0, kind: input, shape index: {}]   ;;  %s738_s2 = inlined_call_operand.vmem [shape: f32[128,128], index: 2, kind: output, shape index: {}]  }
   0x1   :  { %v504_v0 = vld [vmem:[%s736_s1 + $0x38] sm:$0xff]  ;;  %v503_v2 = vld [vmem:[%s736_s1 + $0x30] sm:$0xff]  ;;  %v502_v4 = vld [vmem:[%s736_s1 + $0x28] sm:$0xff] }
   0x2   :  { %v512_v1 = vld [vmem:[%s736_s1 + $0x78] sm:$0xff]  ;;  %235 = vmatpush.bf16.msra.mxu0 %v504_v0  ;;  %513 = vmatpush.bf16.msra.mxu2 %v504_v0  ;;  %v511_v3 = vld [vmem:[%s736_s1 + $0x70] sm:$0xff]  ;;  %v510_v5 = vld [vmem:[%s736_s1 + $0x68] sm:$0xff] }
   0x3   :  { %284 = vmatpush.bf16.msra.mxu1 %v512_v1  ;;  %521 = vmatpush.bf16.msra.mxu3 %v512_v1  ;;  %v501_v6 = vld [vmem:[%s736_s1 + $0x20] sm:$0xff]  ;;  %v500_v8 = vld [vmem:[%s736_s1 + $0x18] sm:$0xff]  ;;  %v499_v10 = vld [vmem:[%s736_s1 + $0x10] sm:$0xff] }
   0x4   :  { %v509_v7 = vld [vmem:[%s736_s1 + $0x60] sm:$0xff]  ;;  %v508_v9 = vld [vmem:[%s736_s1 + $0x58] sm:$0xff]  ;;  %v507_v11 = vld [vmem:[%s736_s1 + $0x50] sm:$0xff] }
   0x5   :  { %v498_v12 = vld [vmem:[%s736_s1 + $0x8] sm:$0xff]  ;;  %v497_v14 = vld [vmem:[%s736_s1] sm:$0xff]  ;;  %v363_v28 = vld [vmem:[%s737_s0 + $0x10] sm:$0xf] }
   0x6   :  { %236 = vmatpush.bf16.msra.mxu0 %v503_v2  ;;  %514 = vmatpush.bf16.msra.mxu2 %v503_v2  ;;  %v506_v13 = vld [vmem:[%s736_s1 + $0x48] sm:$0xff]  ;;  %v505_v15 = vld [vmem:[%s736_s1 + $0x40] sm:$0xff]  ;;  %v484_v29 = vld [vmem:[%s737_s0 + $0x14] sm:$0xf0] }
   0x7   :  { %285 = vmatpush.bf16.msra.mxu1 %v511_v3  ;;  %522 = vmatpush.bf16.msra.mxu3 %v511_v3  ;;  %v355_v16 = vld [vmem:[%s737_s0] sm:$0xf]  ;;  %v482_v17 = vld [vmem:[%s737_s0 + $0x4] sm:$0xf0]  ;;  %v481_v20 = vld [vmem:[%s737_s0 + $0x4] sm:$0xf]  ;;  %v364_v36 = vor.u32 %v484_v29, %v363_v28 }
   0x8   :  { %v387_v18 = vld [vmem:[%s737_s0 + $0x40] sm:$0xf]  ;;  %v490_v19 = vld [vmem:[%s737_s0 + $0x44] sm:$0xf0]  ;;  %v357_v21 = vld [vmem:[%s737_s0 + $0x8] sm:$0xf0]  ;;  %v356_v24 = vor.u32 %v482_v17, %v355_v16 }
   0x9   :  { %v489_v22 = vld [vmem:[%s737_s0 + $0x44] sm:$0xf]  ;;  %v389_v23 = vld [vmem:[%s737_s0 + $0x48] sm:$0xf0]  ;;  %v388_v25 = vor.u32 %v490_v19, %v387_v18  ;;  %v360_v26 = vor.u32 %v481_v20, %v357_v21  ;;  %v395_v30 = vld [vmem:[%s737_s0 + $0x50] sm:$0xf] }
   0xa   :  { %237 = vmatpush.bf16.msra.mxu0 %v502_v4  ;;  %515 = vmatpush.bf16.msra.mxu2 %v502_v4  ;;  %v392_v27 = vor.u32 %v489_v22, %v389_v23  ;;  %v492_v31 = vld [vmem:[%s737_s0 + $0x54] sm:$0xf0]  ;;  %v483_v32 = vld [vmem:[%s737_s0 + $0x14] sm:$0xf]  ;;  %v365_v33 = vld [vmem:[%s737_s0 + $0x18] sm:$0xf0] }
   0xb   :  { %286 = vmatpush.bf16.msra.mxu1 %v510_v5  ;;  %523 = vmatpush.bf16.msra.mxu3 %v510_v5  ;;  %v491_v34 = vld [vmem:[%s737_s0 + $0x54] sm:$0xf]  ;;  %v397_v35 = vld [vmem:[%s737_s0 + $0x58] sm:$0xf0]  ;;  %v396_v37 = vor.u32 %v492_v31, %v395_v30  ;;  %v368_v38 = vor.u32 %v483_v32, %v365_v33  ;;  %v371_v40 = vld [vmem:[%s737_s0 + $0x20] sm:$0xf] }
   0xc   :  { %v400_v39 = vor.u32 %v491_v34, %v397_v35  ;;  %v486_v41 = vld [vmem:[%s737_s0 + $0x24] sm:$0xf0]  ;;  %v403_v42 = vld [vmem:[%s737_s0 + $0x60] sm:$0xf]  ;;  %v485_v44 = vld [vmem:[%s737_s0 + $0x24] sm:$0xf] }
   0xd   :  { %v494_v43 = vld [vmem:[%s737_s0 + $0x64] sm:$0xf0]  ;;  %v373_v45 = vld [vmem:[%s737_s0 + $0x28] sm:$0xf0]  ;;  %v493_v46 = vld [vmem:[%s737_s0 + $0x64] sm:$0xf]  ;;  %v372_v48 = vor.u32 %v486_v41, %v371_v40 }
   0xe   :  { %238 = vmatpush.bf16.msra.mxu0 %v501_v6  ;;  %516 = vmatpush.bf16.msra.mxu2 %v501_v6  ;;  %v405_v47 = vld [vmem:[%s737_s0 + $0x68] sm:$0xf0]  ;;  %v404_v49 = vor.u32 %v494_v43, %v403_v42  ;;  %v376_v50 = vor.u32 %v485_v44, %v373_v45  ;;  %v379_v52 = vld [vmem:[%s737_s0 + $0x30] sm:$0xf]  ;;  %v488_v53 = vld [vmem:[%s737_s0 + $0x34] sm:$0xf0] }
   0xf   :  { %287 = vmatpush.bf16.msra.mxu1 %v509_v7  ;;  %524 = vmatpush.bf16.msra.mxu3 %v509_v7  ;;  %v408_v51 = vor.u32 %v493_v46, %v405_v47  ;;  %v411_v54 = vld [vmem:[%s737_s0 + $0x70] sm:$0xf]  ;;  %v496_v55 = vld [vmem:[%s737_s0 + $0x74] sm:$0xf0]  ;;  %v487_v56 = vld [vmem:[%s737_s0 + $0x34] sm:$0xf]  ;;  %v380_v60 = vor.u32 %v488_v53, %v379_v52 }
  0x10   :  { %v381_v57 = vld [vmem:[%s737_s0 + $0x38] sm:$0xf0]  ;;  %v495_v58 = vld [vmem:[%s737_s0 + $0x74] sm:$0xf]  ;;  %v412_v61 = vor.u32 %v496_v55, %v411_v54 }
  0x11   :  { %v413_v59 = vld [vmem:[%s737_s0 + $0x78] sm:$0xf0]  ;;  %v384_v62 = vor.u32 %v487_v56, %v381_v57 }
  0x12   :  { %239 = vmatpush.bf16.msra.mxu0 %v500_v8  ;;  %517 = vmatpush.bf16.msra.mxu2 %v500_v8  ;;  %v416_v63 = vor.u32 %v495_v58, %v413_v59 }
  0x13   :  { %288 = vmatpush.bf16.msra.mxu1 %v508_v9  ;;  %525 = vmatpush.bf16.msra.mxu3 %v508_v9 }
  0x16   :  { %240 = vmatpush.bf16.msra.mxu0 %v499_v10  ;;  %518 = vmatpush.bf16.msra.mxu2 %v499_v10 }
  0x17   :  { %289 = vmatpush.bf16.msra.mxu1 %v507_v11  ;;  %526 = vmatpush.bf16.msra.mxu3 %v507_v11 }
  0x1a   :  { %241 = vmatpush.bf16.msra.mxu0 %v498_v12  ;;  %519 = vmatpush.bf16.msra.mxu2 %v498_v12 }
  0x1b   :  { %290 = vmatpush.bf16.msra.mxu1 %v506_v13  ;;  %527 = vmatpush.bf16.msra.mxu3 %v506_v13 }
  0x1e   :  { %242 = vmatpush.bf16.msra.mxu0 %v497_v14  ;;  %520 = vmatpush.bf16.msra.mxu2 %v497_v14 }
  0x1f   :  { %291 = vmatpush.bf16.msra.mxu1 %v505_v15  ;;  %528 = vmatpush.bf16.msra.mxu3 %v505_v15 }
  0x21   :  { %243 = vmatmul.bf16.vlgmr.msra.gmra.mxu0 %v356_v24  ;;  %263 = vmatmul.bf16.vlgmr.msra.gmra.mxu2 %v388_v25 }
  0x22   :  { %292 = vmatmul.bf16.vlgmr.msra.gmra.mxu1 %v360_v26  ;;  %312 = vmatmul.bf16.vlgmr.msra.gmra.mxu3 %v392_v27 }
  0x31   :  { %248 = vmatmul.bf16.gmra.mxu0 %v364_v36  ;;  %268 = vmatmul.bf16.gmra.mxu2 %v396_v37 }
  0x32   :  { %297 = vmatmul.bf16.gmra.mxu1 %v368_v38  ;;  %317 = vmatmul.bf16.gmra.mxu3 %v400_v39 }
  0x41   :  { %253 = vmatmul.bf16.gmra.mxu0 %v372_v48  ;;  %273 = vmatmul.bf16.gmra.mxu2 %v404_v49 }
  0x42   :  { %302 = vmatmul.bf16.gmra.mxu1 %v376_v50  ;;  %322 = vmatmul.bf16.gmra.mxu3 %v408_v51 }
  0x51   :  { %258 = vmatmul.bf16.gmra.mxu0 %v380_v60  ;;  %278 = vmatmul.bf16.gmra.mxu2 %v412_v61 }
  0x52   :  { %307 = vmatmul.bf16.gmra.mxu1 %v384_v62  ;;  %327 = vmatmul.bf16.gmra.mxu3 %v416_v63 }
  0x9e   :  { %v244_v0 = vpop.f32.mrf.mxu0 }
  0x9f   :  { %v293_v1 = vpop.f32.mrf.mxu1 }
  0xa0   :  { %v294_v2 = vadd.f32 %v293_v1, %v244_v0 }
  0xa2   :  { %333 = vst [vmem:[%s738_s2] sm:$0xff] %v294_v2 }
  0xa4   :  { %v264_v3 = vpop.f32.mrf.mxu2 }
  0xa5   :  { %v313_v4 = vpop.f32.mrf.mxu3 }
  0xa6   :  { %v314_v5 = vadd.f32 %v313_v4, %v264_v3  ;;  %v246_v6 = vpop.f32.mrf.mxu0 }
  0xa7   :  { %v295_v7 = vpop.f32.mrf.mxu1 }
  0xa8   :  { %341 = vst [vmem:[%s738_s2 + $0x40] sm:$0xff] %v314_v5  ;;  %v296_v8 = vadd.f32 %v295_v7, %v246_v6 }
  0xaa   :  { %334 = vst [vmem:[%s738_s2 + $0x8] sm:$0xff] %v296_v8 }
  0xac   :  { %v266_v9 = vpop.f32.mrf.mxu2 }
  0xad   :  { %v315_v10 = vpop.f32.mrf.mxu3 }
  0xae   :  { %v316_v11 = vadd.f32 %v315_v10, %v266_v9  ;;  %v249_v12 = vpop.f32.mrf.mxu0 }
  0xaf   :  { %v298_v13 = vpop.f32.mrf.mxu1 }
  0xb0   :  { %342 = vst [vmem:[%s738_s2 + $0x48] sm:$0xff] %v316_v11  ;;  %v299_v14 = vadd.f32 %v298_v13, %v249_v12 }
  0xb2   :  { %335 = vst [vmem:[%s738_s2 + $0x10] sm:$0xff] %v299_v14 }
  0xb4   :  { %v269_v15 = vpop.f32.mrf.mxu2 }
  0xb5   :  { %v318_v16 = vpop.f32.mrf.mxu3 }
  0xb6   :  { %v319_v17 = vadd.f32 %v318_v16, %v269_v15  ;;  %v251_v18 = vpop.f32.mrf.mxu0 }
  0xb7   :  { %v300_v19 = vpop.f32.mrf.mxu1 }
  0xb8   :  { %343 = vst [vmem:[%s738_s2 + $0x50] sm:$0xff] %v319_v17  ;;  %v301_v20 = vadd.f32 %v300_v19, %v251_v18 }
  0xba   :  { %336 = vst [vmem:[%s738_s2 + $0x18] sm:$0xff] %v301_v20 }
  0xbc   :  { %v271_v21 = vpop.f32.mrf.mxu2 }
  0xbd   :  { %v320_v22 = vpop.f32.mrf.mxu3 }
  0xbe   :  { %v321_v23 = vadd.f32 %v320_v22, %v271_v21  ;;  %v254_v24 = vpop.f32.mrf.mxu0 }
  0xbf   :  { %v303_v25 = vpop.f32.mrf.mxu1 }
  0xc0   :  { %344 = vst [vmem:[%s738_s2 + $0x58] sm:$0xff] %v321_v23  ;;  %v304_v26 = vadd.f32 %v303_v25, %v254_v24 }
  0xc2   :  { %337 = vst [vmem:[%s738_s2 + $0x20] sm:$0xff] %v304_v26 }
  0xc4   :  { %v274_v27 = vpop.f32.mrf.mxu2 }
  0xc5   :  { %v323_v28 = vpop.f32.mrf.mxu3 }
  0xc6   :  { %v324_v29 = vadd.f32 %v323_v28, %v274_v27  ;;  %v256_v30 = vpop.f32.mrf.mxu0 }
  0xc7   :  { %v305_v31 = vpop.f32.mrf.mxu1 }
  0xc8   :  { %345 = vst [vmem:[%s738_s2 + $0x60] sm:$0xff] %v324_v29  ;;  %v306_v32 = vadd.f32 %v305_v31, %v256_v30 }
  0xca   :  { %338 = vst [vmem:[%s738_s2 + $0x28] sm:$0xff] %v306_v32 }
  0xcc   :  { %v276_v33 = vpop.f32.mrf.mxu2 }
  0xcd   :  { %v325_v34 = vpop.f32.mrf.mxu3 }
  0xce   :  { %v326_v35 = vadd.f32 %v325_v34, %v276_v33  ;;  %v259_v36 = vpop.f32.mrf.mxu0 }
  0xcf   :  { %v308_v37 = vpop.f32.mrf.mxu1 }
  0xd0   :  { %346 = vst [vmem:[%s738_s2 + $0x68] sm:$0xff] %v326_v35  ;;  %v309_v38 = vadd.f32 %v308_v37, %v259_v36 }
  0xd2   :  { %339 = vst [vmem:[%s738_s2 + $0x30] sm:$0xff] %v309_v38 }
  0xd4   :  { %v279_v39 = vpop.f32.mrf.mxu2 }
  0xd5   :  { %v328_v40 = vpop.f32.mrf.mxu3 }
  0xd6   :  { %v329_v41 = vadd.f32 %v328_v40, %v279_v39  ;;  %v261_v42 = vpop.f32.mrf.mxu0 }
  0xd7   :  { %v310_v43 = vpop.f32.mrf.mxu1 }
  0xd8   :  { %347 = vst [vmem:[%s738_s2 + $0x70] sm:$0xff] %v329_v41  ;;  %v311_v44 = vadd.f32 %v310_v43, %v261_v42 }
  0xda   :  { %340 = vst [vmem:[%s738_s2 + $0x38] sm:$0xff] %v311_v44 }
  0xdc   :  { %v281_v45 = vpop.f32.mrf.mxu2 }
  0xdd   :  { %v330_v46 = vpop.f32.mrf.mxu3 }
  0xde   :  { %v331_v47 = vadd.f32 %v330_v46, %v281_v45 }
  0xe0   :  { %348 = vst [vmem:[%s738_s2 + $0x78] sm:$0xff] %v331_v47 }

// kernel: attention_gate_forward.3
= control target key start
LH: loop header
LB: loop body
LE: loop exit
PB: predicated region body
PF: predicated region fallthrough
CT: control target
= control target key end

     0   :  { %s3283_s0 = inlined_call_operand.vmem [shape: bf16[512,128], index: 0, kind: input, shape index: {}]   ;;  %s3284_s1 = inlined_call_operand.vmem [shape: bf16[512,128], index: 1, kind: input, shape index: {}]   ;;  %s3285_s2 = inlined_call_operand.vmem [shape: bf16[128,128], index: 2, kind: input, shape index: {}]   ;;  %s3286_s3 = inlined_call_operand.vmem [shape: f32[1,128], index: 3, kind: input, shape index: {}]   ;;  %s3287_s4 = inlined_call_operand.vmem [shape: bf16[128,1], index: 4, kind: input, shape index: {}]   ;;  %s3288_s5 = inlined_call_operand.<no memory space> [shape: f32[1,1], index: 5, kind: input, shape index: {}]   ;;  %s3289_s6 = inlined_call_operand.hbm [shape: f32[512,128], index: 6, kind: output, shape index: {}]  }
   0x1   :  { %11 = sst [smem:[#allocation2]] %s3288_s5 }
   0x2   :  { %12 = vsyncpa [#allocation4], 0 }
   0x3   :  { %14 = vsyncpa [#allocation4 + $0x1], 0  ;;  %s2395_s23 = smov 0   ;;  %s2397_s24 = smov 0  }
   0x4   :  { %s2399_s25 = smov 0   ;;  %s2401_s26 = smov 0  }
   0x5 LB: > { %s2416_s5 = sadd.s32 4294967295, %s2352_s26   ;;  %s1814_s27 = sadd.s32 4294967294, %s2352_s26   ;;  %s2352_s26 = sphi %s2401_s26, %s3349_s26   ;;  %s2348_s25 = sphi %s2399_s25, %s3348_s25   ;;  %s2344_s24 = sphi %s2397_s24, %s3347_s24   ;;  %s2340_s23 = sphi %s2395_s23, %s3346_s23  }
   0x6   : > { %s2420_s28 = sadd.s32 1, %s2352_s26   ;;  %s163_s29 = sadd.s32 1, %s2348_s25 }
   0x7   : > { %s160_s30 = ssub.s32 %s2352_s26, %s2420_s28  ;;  %p173_p0 = scmp.ne.s32.totalorder %s2348_s25, %s2344_s24 }
   0x8   : > { %p161_p1 = scmp.eq.s32.totalorder %s160_s30, 0  ;;  %p174_p2 = scmp.eq.s32.totalorder %s2416_s5, 1 }
   0x9   : > { %p179_p3 = scmp.ne.s32.totalorder %s2344_s24, %s2340_s23  ;;  %p180_p4 = scmp.eq.s32.totalorder %s1814_s27, 1 }
   0xa   : > { %s2431_s7 = scalar_select %p161_p1, %s2348_s25, %s163_s29  }
   0xb   : > { %p2433_p5 = por %p174_p2, %p173_p0  ;;  %p2437_p6 = por %p180_p4, %p179_p3 }
   0xc   : > { %p1817_p7 = scmp.ge.s32.totalorder %s2352_s26, 1  ;;  %p228_p8 = scmp.lt.s32.totalorder %s2352_s26, 3 }
   0xe   : > { %p229_p9 = pnand %p1817_p7, %p228_p8 }
   0xf   : > { %s1819_s18 = sshll.u32 (!%p229_p9), %s2416_s5, 5  ;;  %s2020_s11 = sshll.u32 (!%p229_p9), %s2416_s5, 8 }
  0x10   : > { %232 = sbr.rel (%p229_p9) target bundleno = 604 (0x25c), region = 44  ;;  %p264_p10 = scmp.lt.s32.totalorder (!%p229_p9), %s1819_s18, 63 }
  0x11   : > { %s1736_s15 = scalar_lea.hbm (!%p229_p9), %s3289_s6, %s2020_s11  ;;  %s2310_s22 = scalar_lea.hbm (!%p229_p9), %s3289_s6, 512 }
  0x12   : > { %s1739_s17 = sshll.u32 (!%p229_p9), %s1736_s15, 4  ;;  %s1740_s17 = int_to_ptr.hbm [resolvable:$true] %s1739_s17 }
  0x15   : > { %v2011_v0 = vld [vmem:[%s3285_s2 + $0x38] sm:$0xff]  ;;  %v2010_v1 = vld [vmem:[%s3285_s2 + $0x30] sm:$0xff]  ;;  %v2009_v2 = vld [vmem:[%s3285_s2 + $0x28] sm:$0xff]  ;;  %s3351_s18 = smov (!%p264_p10, %s1819_s18), 63 }
  0x16   : > { %532 = vmatpush.bf16.msra.mxu0 %v2011_v0  ;;  %2100 = vmatpush.bf16.msra.mxu2 %v2011_v0  ;;  %v2008_v3 = vld [vmem:[%s3285_s2 + $0x20] sm:$0xff]  ;;  %v2007_v4 = vld [vmem:[%s3285_s2 + $0x18] sm:$0xff]  ;;  %v2006_v5 = vld [vmem:[%s3285_s2 + $0x10] sm:$0xff]  ;;  %s1820_s30 = sshll.u32 %s3351_s18, 2  ;;  %s721_s18 = sld [smem:[#allocation2]] }
  0x17   : > { %v2005_v6 = vld [vmem:[%s3285_s2 + $0x8] sm:$0xff]  ;;  %v2004_v7 = vld [vmem:[%s3285_s2] sm:$0xff]  ;;  %s2476_s14 = scalar_lea.vmem %s3283_s0, %s1820_s30  ;;  %v2019_v18 = vld [vmem:[%s3287_s4 + $0x38] sm:$0xff]  ;;  %s2523_s21 = scalar_lea.vmem %s3284_s1, %s1820_s30 }
  0x18   : > { %v1988_v8 = vld [vmem:[%s2476_s14] sm:$0xff]  ;;  %v1989_v10 = vld [vmem:[%s2476_s14 + $0x8] sm:$0xff]  ;;  %v1990_v12 = vld [vmem:[%s2476_s14 + $0x10] sm:$0xff]  ;;  %771 = vmatpush.bf16.msra.mxu1 %v2019_v18  ;;  %2108 = vmatpush.bf16.msra.mxu3 %v2019_v18  ;;  %s260_s30 = sand.u32 1, %s2344_s24  }
  0x19   : > { %v1996_v9 = vld [vmem:[%s2476_s14 + $0x40] sm:$0xff]  ;;  %v1997_v11 = vld [vmem:[%s2476_s14 + $0x48] sm:$0xff]  ;;  %v1998_v13 = vld [vmem:[%s2476_s14 + $0x50] sm:$0xff]  ;;  %s1818_s29 = sshll.u32 %s260_s30, 8  ;;  %s1725_s5 = scalar_lea.sflag [#allocation4], %s260_s30 }
  0x1a   : > { %533 = vmatpush.bf16.msra.mxu0 %v2010_v1  ;;  %2101 = vmatpush.bf16.msra.mxu2 %v2010_v1  ;;  %v1991_v14 = vld [vmem:[%s2476_s14 + $0x18] sm:$0xff]  ;;  %v1992_v16 = vld [vmem:[%s2476_s14 + $0x20] sm:$0xff]  ;;  %v1993_v19 = vld [vmem:[%s2476_s14 + $0x28] sm:$0xff]  ;;  %s3155_s10 = scalar_lea.vmem [#allocation3], %s1818_s29 }
  0x1b   : > { %v1999_v15 = vld [vmem:[%s2476_s14 + $0x58] sm:$0xff]  ;;  %v2000_v17 = vld [vmem:[%s2476_s14 + $0x60] sm:$0xff]  ;;  %v2001_v20 = vld [vmem:[%s2476_s14 + $0x68] sm:$0xff]  ;;  %s1737_s16 = sshll.u32 %s3155_s10, 4  ;;  %s1738_s16 = int_to_ptr.vmem [resolvable:$true] %s1737_s16 }
  0x1c   : > { %v2018_v21 = vld [vmem:[%s3287_s4 + $0x30] sm:$0xff]  ;;  %v2017_v22 = vld [vmem:[%s3287_s4 + $0x28] sm:$0xff]  ;;  %v2016_v23 = vld [vmem:[%s3287_s4 + $0x20] sm:$0xff] }
  0x1d   : > { %772 = vmatpush.bf16.msra.mxu1 %v2018_v21  ;;  %2109 = vmatpush.bf16.msra.mxu3 %v2018_v21  ;;  %v1994_v24 = vld [vmem:[%s2476_s14 + $0x30] sm:$0xff]  ;;  %v2015_v26 = vld [vmem:[%s3287_s4 + $0x18] sm:$0xff]  ;;  %v2013_v28 = vld [vmem:[%s3287_s4 + $0x8] sm:$0xff] }
  0x1e   : > { %534 = vmatpush.bf16.msra.mxu0 %v2009_v2  ;;  %2102 = vmatpush.bf16.msra.mxu2 %v2009_v2  ;;  %v2002_v25 = vld [vmem:[%s2476_s14 + $0x70] sm:$0xff]  ;;  %v2012_v29 = vld [vmem:[%s3287_s4] sm:$0xff]  ;;  %v1995_v30 = vld [vmem:[%s2476_s14 + $0x38] sm:$0xff] }
  0x1f   : > { %v2014_v27 = vld [vmem:[%s3287_s4 + $0x10] sm:$0xff]  ;;  %v2003_v31 = vld [vmem:[%s2476_s14 + $0x78] sm:$0xff]  ;;  %v2022_v32 = vld [vmem:[%s2523_s21] sm:$0xff]  }
  0x20   : > { %v2023_v34 = vunpack.c.l.bf16 %v2022_v32  ;;  %v2092_v35 = vld [vmem:[%s2523_s21 + $0x40] sm:$0xff]   ;;  %v2024_v38 = vunpack.c.h.bf16 %v2022_v32  ;;  %v2085_v50 = vld [vmem:[%s2523_s21 + $0x8] sm:$0xff]  }
  0x21   : > { %773 = vmatpush.bf16.msra.mxu1 %v2017_v22  ;;  %2110 = vmatpush.bf16.msra.mxu3 %v2017_v22  ;;  %v2530_v37 = vld [vmem:[%s3286_s3] ss:$0 sm:$0xff]  ;;  %v2055_v40 = vunpack.c.l.bf16 %v2092_v35  ;;  %v2056_v46 = vunpack.c.h.bf16 %v2092_v35  ;;  %v2027_v56 = vunpack.c.l.bf16 %v2085_v50  ;;  %v2093_v59 = vld [vmem:[%s2523_s21 + $0x48] sm:$0xff]   ;;  %v2028_v62 = vunpack.c.h.bf16 %v2085_v50 }
  0x22   : > { %535 = vmatpush.bf16.msra.mxu0 %v2008_v3  ;;  %2103 = vmatpush.bf16.msra.mxu2 %v2008_v3  ;;  %v2059_v0 = vunpack.c.l.bf16 %v2093_v59 }
  0x25   : > { %774 = vmatpush.bf16.msra.mxu1 %v2016_v23  ;;  %2111 = vmatpush.bf16.msra.mxu3 %v2016_v23 }
  0x26   : > { %536 = vmatpush.bf16.msra.mxu0 %v2007_v4  ;;  %2104 = vmatpush.bf16.msra.mxu2 %v2007_v4 }
  0x29   : > { %775 = vmatpush.bf16.msra.mxu1 %v2015_v26  ;;  %2112 = vmatpush.bf16.msra.mxu3 %v2015_v26 }
  0x2a   : > { %537 = vmatpush.bf16.msra.mxu0 %v2006_v5  ;;  %2105 = vmatpush.bf16.msra.mxu2 %v2006_v5 }
  0x2d   : > { %776 = vmatpush.bf16.msra.mxu1 %v2014_v27  ;;  %2113 = vmatpush.bf16.msra.mxu3 %v2014_v27 }
  0x2e   : > { %538 = vmatpush.bf16.msra.mxu0 %v2005_v6  ;;  %2106 = vmatpush.bf16.msra.mxu2 %v2005_v6  ;;  %v2060_v6 = vunpack.c.h.bf16 %v2093_v59  ;;  %v2088_v59 = vld [vmem:[%s2523_s21 + $0x20] sm:$0xff]  }
  0x31   : > { %777 = vmatpush.bf16.msra.mxu1 %v2013_v28  ;;  %2114 = vmatpush.bf16.msra.mxu3 %v2013_v28 }
  0x32   : > { %539 = vmatpush.bf16.msra.mxu0 %v2004_v7  ;;  %2107 = vmatpush.bf16.msra.mxu2 %v2004_v7 }
  0x35   : > { %540 = vmatmul.bf16.vlgmr.msra.gmra.mxu0 %v1988_v8  ;;  %580 = vmatmul.bf16.vlgmr.msra.gmra.mxu2 %v1996_v9 }
  0x36   : > { %778 = vmatpush.bf16.msra.mxu1 %v2012_v29  ;;  %2115 = vmatpush.bf16.msra.mxu3 %v2012_v29 }
  0x45   : > { %545 = vmatmul.bf16.gmra.mxu0 %v1989_v10  ;;  %585 = vmatmul.bf16.gmra.mxu2 %v1997_v11  ;;  %v2086_v10 = vld [vmem:[%s2523_s21 + $0x10] sm:$0xff]  }
  0x46   : > { %v2032_v22 = vunpack.c.h.bf16 %v2086_v10 }
  0x55   : > { %550 = vmatmul.bf16.gmra.mxu0 %v1990_v12  ;;  %590 = vmatmul.bf16.gmra.mxu2 %v1998_v13 }
  0x65   : > { %555 = vmatmul.bf16.gmra.mxu0 %v1991_v14  ;;  %595 = vmatmul.bf16.gmra.mxu2 %v1999_v15 }
  0x75   : > { %560 = vmatmul.bf16.gmra.mxu0 %v1992_v16  ;;  %600 = vmatmul.bf16.gmra.mxu2 %v2000_v17  ;;  %v2031_v16 = vunpack.c.l.bf16 %v2086_v10 }
  0x85   : > { %565 = vmatmul.bf16.gmra.mxu0 %v1993_v19  ;;  %605 = vmatmul.bf16.gmra.mxu2 %v2001_v20  ;;  %v2094_v19 = vld [vmem:[%s2523_s21 + $0x50] sm:$0xff]  }
  0x95   : > { %570 = vmatmul.bf16.gmra.mxu0 %v1994_v24  ;;  %610 = vmatmul.bf16.gmra.mxu2 %v2002_v25  ;;  %v2063_v24 = vunpack.c.l.bf16 %v2094_v19 }
  0xa5   : > { %575 = vmatmul.bf16.gmra.mxu0 %v1995_v30  ;;  %615 = vmatmul.bf16.gmra.mxu2 %v2003_v31  ;;  %v2064_v30 = vunpack.c.h.bf16 %v2094_v19  ;;  %v2089_v19 = vld [vmem:[%s2523_s21 + $0x28] sm:$0xff]  }
  0xb2   : > { %v541_v33 = vpop.f32.mrf.mxu0 }
  0xb3   : > { %v542_v36 = vadd.f32 %v2023_v34, %v541_v33  ;;  %v2087_v34 = vld [vmem:[%s2523_s21 + $0x18] sm:$0xff]  }
  0xb5   : > { %v625_v42 = vadd.f32 %v2530_v37, %v542_v36 }
  0xb7   : > { %v657_v47 = vmax.f32 %v625_v42, 0.0 }
  0xb8   : > { %v581_v39 = vpop.f32.mrf.mxu2 }
  0xb9   : > { %v582_v44 = vadd.f32 %v2055_v40, %v581_v39 }
  0xba   : > { %v543_v41 = vpop.f32.mrf.mxu0 }
  0xbb   : > { %v544_v43 = vadd.f32 %v2024_v38, %v543_v41  ;;  %v641_v51 = vadd.f32 %v2530_v37, %v582_v44  ;;  %v2035_v41 = vunpack.c.l.bf16 %v2087_v34  ;;  %v2095_v44 = vld [vmem:[%s2523_s21 + $0x58] sm:$0xff]  }
  0xbd   : > { %v626_v45 = vadd.f32 %v2530_v37, %v544_v43  ;;  %v673_v57 = vmax.f32 %v641_v51, 0.0 }
  0xbf   : > { %v658_v48 = vmax.f32 %v626_v45, 0.0 }
  0xc0   : > { %v583_v49 = vpop.f32.mrf.mxu2 }
  0xc1   : > { %v584_v52 = vadd.f32 %v2056_v46, %v583_v49  ;;  %v689_v53 = vpack.c.bf16 %v658_v48, %v657_v47  ;;  %v2036_v47 = vunpack.c.h.bf16 %v2087_v34  ;;  %v2067_v49 = vunpack.c.l.bf16 %v2095_v44 }
  0xc2   : > { %v546_v54 = vpop.f32.mrf.mxu0 }
  0xc3   : > { %v642_v55 = vadd.f32 %v2530_v37, %v584_v52  ;;  %779 = vmatmul.bf16.vlgmr.msra.gmra.mxu1 %v689_v53  ;;  %v547_v60 = vadd.f32 %v2027_v56, %v546_v54 }
  0xc5   : > { %v674_v58 = vmax.f32 %v642_v55, 0.0  ;;  %v627_v2 = vadd.f32 %v2530_v37, %v547_v60  ;;  %v2068_v55 = vunpack.c.h.bf16 %v2095_v44  ;;  %v2090_v44 = vld [vmem:[%s2523_s21 + $0x30] sm:$0xff]  }
  0xc7   : > { %v697_v61 = vpack.c.bf16 %v674_v58, %v673_v57  ;;  %v659_v7 = vmax.f32 %v627_v2, 0.0 }
  0xc8   : > { %v586_v63 = vpop.f32.mrf.mxu2 }
  0xc9   : > { %819 = vmatmul.bf16.vlgmr.msra.gmra.mxu3 %v697_v61  ;;  %v587_v4 = vadd.f32 %v2059_v0, %v586_v63 }
  0xca   : > { %v548_v1 = vpop.f32.mrf.mxu0 }
  0xcb   : > { %v549_v3 = vadd.f32 %v2028_v62, %v548_v1  ;;  %v643_v11 = vadd.f32 %v2530_v37, %v587_v4  ;;  %v2039_v1 = vunpack.c.l.bf16 %v2088_v59  ;;  %v2096_v4 = vld [vmem:[%s2523_s21 + $0x60] sm:$0xff]  }
  0xcd   : > { %v628_v5 = vadd.f32 %v2530_v37, %v549_v3  ;;  %v675_v17 = vmax.f32 %v643_v11, 0.0 }
  0xcf   : > { %v660_v8 = vmax.f32 %v628_v5, 0.0 }
  0xd0   : > { %v588_v9 = vpop.f32.mrf.mxu2 }
  0xd1   : > { %v589_v12 = vadd.f32 %v2060_v6, %v588_v9  ;;  %v690_v13 = vpack.c.bf16 %v660_v8, %v659_v7  ;;  %v2040_v7 = vunpack.c.h.bf16 %v2088_v59  ;;  %v2071_v9 = vunpack.c.l.bf16 %v2096_v4 }
  0xd2   : > { %v551_v14 = vpop.f32.mrf.mxu0 }
  0xd3   : > { %v644_v15 = vadd.f32 %v2530_v37, %v589_v12  ;;  %784 = vmatmul.bf16.gmra.mxu1 %v690_v13  ;;  %v552_v20 = vadd.f32 %v2031_v16, %v551_v14 }
  0xd5   : > { %v676_v18 = vmax.f32 %v644_v15, 0.0  ;;  %v629_v26 = vadd.f32 %v2530_v37, %v552_v20  ;;  %v2072_v15 = vunpack.c.h.bf16 %v2096_v4  ;;  %v2091_v4 = vld [vmem:[%s2523_s21 + $0x38] sm:$0xff]  }
  0xd7   : > { %v698_v21 = vpack.c.bf16 %v676_v18, %v675_v17  ;;  %v661_v31 = vmax.f32 %v629_v26, 0.0 }
  0xd8   : > { %v591_v23 = vpop.f32.mrf.mxu2 }
  0xd9   : > { %824 = vmatmul.bf16.gmra.mxu3 %v698_v21  ;;  %v592_v28 = vadd.f32 %v2063_v24, %v591_v23 }
  0xda   : > { %v553_v25 = vpop.f32.mrf.mxu0 }
  0xdb   : > { %v554_v27 = vadd.f32 %v2032_v22, %v553_v25  ;;  %v645_v35 = vadd.f32 %v2530_v37, %v592_v28  ;;  %v2043_v25 = vunpack.c.l.bf16 %v2089_v19  ;;  %v2097_v28 = vld [vmem:[%s2523_s21 + $0x68] sm:$0xff]  }
  0xdd   : > { %v630_v29 = vadd.f32 %v2530_v37, %v554_v27  ;;  %v677_v42 = vmax.f32 %v645_v35, 0.0 }
  0xdf   : > { %v662_v32 = vmax.f32 %v630_v29, 0.0 }
  0xe0   : > { %v593_v33 = vpop.f32.mrf.mxu2 }
  0xe1   : > { %v594_v36 = vadd.f32 %v2064_v30, %v593_v33  ;;  %v691_v38 = vpack.c.bf16 %v662_v32, %v661_v31  ;;  %v2044_v31 = vunpack.c.h.bf16 %v2089_v19  ;;  %v2075_v33 = vunpack.c.l.bf16 %v2097_v28 }
  0xe2   : > { %v556_v39 = vpop.f32.mrf.mxu0 }
  0xe3   : > { %v646_v40 = vadd.f32 %v2530_v37, %v594_v36  ;;  %789 = vmatmul.bf16.gmra.mxu1 %v691_v38  ;;  %v557_v45 = vadd.f32 %v2035_v41, %v556_v39 }
  0xe5   : > { %v678_v43 = vmax.f32 %v646_v40, 0.0  ;;  %v631_v51 = vadd.f32 %v2530_v37, %v557_v45  ;;  %v2076_v40 = vunpack.c.h.bf16 %v2097_v28 }
  0xe7   : > { %v699_v46 = vpack.c.bf16 %v678_v43, %v677_v42  ;;  %v663_v56 = vmax.f32 %v631_v51, 0.0 }
  0xe8   : > { %v596_v48 = vpop.f32.mrf.mxu2 }
  0xe9   : > { %829 = vmatmul.bf16.gmra.mxu3 %v699_v46  ;;  %v597_v53 = vadd.f32 %v2067_v49, %v596_v48 }
  0xea   : > { %v558_v50 = vpop.f32.mrf.mxu0 }
  0xeb   : > { %v559_v52 = vadd.f32 %v2036_v47, %v558_v50  ;;  %v647_v60 = vadd.f32 %v2530_v37, %v597_v53  ;;  %v2047_v50 = vunpack.c.l.bf16 %v2090_v44  ;;  %v2098_v53 = vld [vmem:[%s2523_s21 + $0x70] sm:$0xff]  }
  0xed   : > { %v632_v54 = vadd.f32 %v2530_v37, %v559_v52  ;;  %v679_v2 = vmax.f32 %v647_v60, 0.0 }
  0xef   : > { %v664_v57 = vmax.f32 %v632_v54, 0.0 }
  0xf0   : > { %v598_v58 = vpop.f32.mrf.mxu2 }
  0xf1   : > { %v599_v61 = vadd.f32 %v2068_v55, %v598_v58  ;;  %v692_v62 = vpack.c.bf16 %v664_v57, %v663_v56  ;;  %v2048_v56 = vunpack.c.h.bf16 %v2090_v44  ;;  %v2079_v58 = vunpack.c.l.bf16 %v2098_v53 }
  0xf2   : > { %v561_v63 = vpop.f32.mrf.mxu0 }
  0xf3   : > { %v648_v0 = vadd.f32 %v2530_v37, %v599_v61  ;;  %794 = vmatmul.bf16.gmra.mxu1 %v692_v62  ;;  %v562_v5 = vadd.f32 %v2039_v1, %v561_v63 }
  0xf5   : > { %v680_v3 = vmax.f32 %v648_v0, 0.0  ;;  %v633_v11 = vadd.f32 %v2530_v37, %v562_v5  ;;  %v2080_v0 = vunpack.c.h.bf16 %v2098_v53 }
  0xf7   : > { %v700_v6 = vpack.c.bf16 %v680_v3, %v679_v2  ;;  %v665_v16 = vmax.f32 %v633_v11, 0.0 }
  0xf8   : > { %v601_v8 = vpop.f32.mrf.mxu2 }
  0xf9   : > { %834 = vmatmul.bf16.gmra.mxu3 %v700_v6  ;;  %v602_v13 = vadd.f32 %v2071_v9, %v601_v8 }
  0xfa   : > { %v563_v10 = vpop.f32.mrf.mxu0 }
  0xfb   : > { %v564_v12 = vadd.f32 %v2040_v7, %v563_v10  ;;  %v649_v20 = vadd.f32 %v2530_v37, %v602_v13  ;;  %v2051_v10 = vunpack.c.l.bf16 %v2091_v4  ;;  %v2099_v13 = vld [vmem:[%s2523_s21 + $0x78] sm:$0xff]  }
  0xfd   : > { %v634_v14 = vadd.f32 %v2530_v37, %v564_v12  ;;  %v681_v26 = vmax.f32 %v649_v20, 0.0 }
  0xff   : > { %v666_v17 = vmax.f32 %v634_v14, 0.0 }
 0x100   : > { %v603_v18 = vpop.f32.mrf.mxu2 }
 0x101   : > { %v604_v21 = vadd.f32 %v2072_v15, %v603_v18  ;;  %v693_v22 = vpack.c.bf16 %v666_v17, %v665_v16  ;;  %v2052_v16 = vunpack.c.h.bf16 %v2091_v4  ;;  %v2083_v18 = vunpack.c.l.bf16 %v2099_v13 }
 0x102   : > { %v566_v23 = vpop.f32.mrf.mxu0 }
 0x103   : > { %v650_v24 = vadd.f32 %v2530_v37, %v604_v21  ;;  %799 = vmatmul.bf16.gmra.mxu1 %v693_v22  ;;  %v567_v29 = vadd.f32 %v2043_v25, %v566_v23 }
 0x105   : > { %v682_v27 = vmax.f32 %v650_v24, 0.0  ;;  %v635_v35 = vadd.f32 %v2530_v37, %v567_v29  ;;  %v2084_v24 = vunpack.c.h.bf16 %v2099_v13 }
 0x107   : > { %v701_v30 = vpack.c.bf16 %v682_v27, %v681_v26  ;;  %v667_v41 = vmax.f32 %v635_v35, 0.0  ;;  %v2578_v35 = vstv %s721_s18 }
 0x108   : > { %v606_v32 = vpop.f32.mrf.mxu2 }
 0x109   : > { %839 = vmatmul.bf16.gmra.mxu3 %v701_v30  ;;  %v607_v38 = vadd.f32 %v2075_v33, %v606_v32 }
 0x10a   : > { %v568_v34 = vpop.f32.mrf.mxu0 }
 0x10b   : > { %v569_v36 = vadd.f32 %v2044_v31, %v568_v34  ;;  %v651_v45 = vadd.f32 %v2530_v37, %v607_v38 }
 0x10d   : > { %v636_v39 = vadd.f32 %v2530_v37, %v569_v36  ;;  %v683_v51 = vmax.f32 %v651_v45, 0.0  ;;  %v2354_v36 = vmov 0  }
 0x10e   : > { %2158 = vset.pattern.permute.xlu0 %v2354_v36  ;;  %2159 = vset.pattern.permute.xlu1 %v2354_v36 }
 0x10f   : > { %v668_v42 = vmax.f32 %v636_v39, 0.0  ;;  %2160 = vset.pattern.permute.xlu2 %v2354_v36 }
 0x110   : > { %v608_v43 = vpop.f32.mrf.mxu2 }
 0x111   : > { %v609_v46 = vadd.f32 %v2076_v40, %v608_v43  ;;  %v694_v47 = vpack.c.bf16 %v668_v42, %v667_v41 }
 0x112   : > { %v571_v48 = vpop.f32.mrf.mxu0 }
 0x113   : > { %v652_v49 = vadd.f32 %v2530_v37, %v609_v46  ;;  %804 = vmatmul.bf16.gmra.mxu1 %v694_v47  ;;  %v572_v54 = vadd.f32 %v2047_v50, %v571_v48 }
 0x115   : > { %v684_v52 = vmax.f32 %v652_v49, 0.0  ;;  %v637_v60 = vadd.f32 %v2530_v37, %v572_v54 }
 0x117   : > { %v702_v55 = vpack.c.bf16 %v684_v52, %v683_v51  ;;  %v669_v1 = vmax.f32 %v637_v60, 0.0 }
 0x118   : > { %v611_v57 = vpop.f32.mrf.mxu2 }
 0x119   : > { %844 = vmatmul.bf16.gmra.mxu3 %v702_v55  ;;  %v612_v62 = vadd.f32 %v2079_v58, %v611_v57 }
 0x11a   : > { %v573_v59 = vpop.f32.mrf.mxu0 }
 0x11b   : > { %v574_v61 = vadd.f32 %v2048_v56, %v573_v59  ;;  %v653_v5 = vadd.f32 %v2530_v37, %v612_v62 }
 0x11d   : > { %v638_v63 = vadd.f32 %v2530_v37, %v574_v61  ;;  %v685_v11 = vmax.f32 %v653_v5, 0.0 }
 0x11f   : > { %v670_v2 = vmax.f32 %v638_v63, 0.0 }
 0x120   : > { %v613_v3 = vpop.f32.mrf.mxu2 }
 0x121   : > { %v614_v6 = vadd.f32 %v2080_v0, %v613_v3  ;;  %v695_v7 = vpack.c.bf16 %v670_v2, %v669_v1 }
 0x122   : > { %v576_v8 = vpop.f32.mrf.mxu0 }
 0x123   : > { %v654_v9 = vadd.f32 %v2530_v37, %v614_v6  ;;  %809 = vmatmul.bf16.gmra.mxu1 %v695_v7  ;;  %v577_v14 = vadd.f32 %v2051_v10, %v576_v8 }
 0x125   : > { %v686_v12 = vmax.f32 %v654_v9, 0.0  ;;  %v639_v20 = vadd.f32 %v2530_v37, %v577_v14 }
 0x127   : > { %v703_v15 = vpack.c.bf16 %v686_v12, %v685_v11  ;;  %v671_v25 = vmax.f32 %v639_v20, 0.0 }
 0x128   : > { %v616_v17 = vpop.f32.mrf.mxu2 }
 0x129   : > { %849 = vmatmul.bf16.gmra.mxu3 %v703_v15  ;;  %v617_v22 = vadd.f32 %v2083_v18, %v616_v17 }
 0x12a   : > { %v578_v19 = vpop.f32.mrf.mxu0 }
 0x12b   : > { %v579_v21 = vadd.f32 %v2052_v16, %v578_v19  ;;  %v655_v28 = vadd.f32 %v2530_v37, %v617_v22 }
 0x12d   : > { %v640_v23 = vadd.f32 %v2530_v37, %v579_v21  ;;  %v687_v32 = vmax.f32 %v655_v28, 0.0 }
 0x12f   : > { %v672_v26 = vmax.f32 %v640_v23, 0.0 }
 0x130   : > { %v618_v27 = vpop.f32.mrf.mxu2 }
 0x131   : > { %v619_v29 = vadd.f32 %v2084_v24, %v618_v27  ;;  %v696_v30 = vpack.c.bf16 %v672_v26, %v671_v25 }
 0x133   : > { %v656_v31 = vadd.f32 %v2530_v37, %v619_v29  ;;  %814 = vmatmul.bf16.gmra.mxu1 %v696_v30 }
 0x135   : > { %v688_v33 = vmax.f32 %v656_v31, 0.0 }
 0x137   : > { %v704_v34 = vpack.c.bf16 %v688_v33, %v687_v32 }
 0x139   : > { %854 = vmatmul.bf16.gmra.mxu3 %v704_v34 }
 0x140   : > { %v780_v38 = vpop.f32.mrf.mxu1 }
 0x141   : > { %v781_v39 = vadd.f32 %v780_v38, %v2578_v35 }
 0x143   : > { %v1951_v40 = vmul.f32 -1.442695, %v781_v39 }
 0x145   : > { %2162 = vpow2.f32 %v1951_v40 }
 0x148   : > { %v782_v41 = vpop.f32.mrf.mxu1 }
 0x149   : > { %v783_v37 = vadd.f32 %v782_v41, %v2578_v35 }
 0x14b   : > { %v2163_v42 = vpop.eup %2162  ;;  %v1952_v43 = vmul.f32 -1.442695, %v783_v37 }
 0x14c   : > { %v956_v44 = vadd.f32 1.0, %v2163_v42  ;;  %v820_v45 = vpop.f32.mrf.mxu3 }
 0x14d   : > { %2164 = vpow2.f32 %v1952_v43  ;;  %v821_v46 = vadd.f32 %v820_v45, %v2578_v35 }
 0x14e   : > { %2166 = vrcp.f32 %v956_v44  ;;  %v997_v62 = vand.u32 2147483647, %v956_v44  ;;  %v999_v63 = vand.u32 2147483648, %v956_v44  ;;  %vm993_vm1 = vweird.f32 %v956_v44 }
 0x14f   : > { %v1967_v47 = vmul.f32 -1.442695, %v821_v46 }
 0x150   : > { %v785_v48 = vpop.f32.mrf.mxu1  ;;  %vm998_vm3 = vcmp.eq.f32.partialorder %v997_v62, 8.507059e+37  ;;  %v1000_v8 = vor.u32 1.1754944e-38, %v999_v63 }
 0x151   : > { %2168 = vpow2.f32 %v1967_v47  ;;  %v786_v49 = vadd.f32 %v785_v48, %v2578_v35 }
 0x153   : > { %v2165_v50 = vpop.eup %2164  ;;  %v1953_v51 = vmul.f32 -1.442695, %v786_v49 }
 0x154   : > { %v2167_v52 = vpop.eup %2166  ;;  %v2584_v53 = vadd.f32 1.0, %v2165_v50  ;;  %v822_v54 = vpop.f32.mrf.mxu3 }
 0x155   : > { %2170 = vpow2.f32 %v1953_v51  ;;  %v823_v55 = vadd.f32 %v822_v54, %v2578_v35  ;;  %v989_v56 = vmul.f32 %v2167_v52, %v956_v44  ;;  %vm994_vm0 = vweird.f32 %v2167_v52 }
 0x156   : > { %2172 = vrcp.f32 %v2584_v53  ;;  %vm995_vm2 = vmor %vm993_vm1, %vm994_vm0  ;;  %v1012_v9 = vand.u32 2147483647, %v2584_v53  ;;  %v1014_v14 = vand.u32 2147483648, %v2584_v53  ;;  %vm1008_vm4 = vweird.f32 %v2584_v53 }
 0x157   : > { %v2169_v57 = vpop.eup %2168  ;;  %v1968_v58 = vmul.f32 -1.442695, %v823_v55  ;;  %v990_v59 = vsub.f32 1.0, %v989_v56 }
 0x158   : > { %v2588_v60 = vadd.f32 1.0, %v2169_v57  ;;  %v787_v61 = vpop.f32.mrf.mxu1  ;;  %vm2604_vm6 = vcmp.eq.f32.partialorder %v1012_v9, 8.507059e+37  ;;  %v1015_v27 = vor.u32 1.1754944e-38, %v1014_v14 }
 0x159   : > { %2174 = vpow2.f32 %v1968_v58  ;;  %v788_v0 = vadd.f32 %v787_v61, %v2578_v35  ;;  %v991_v1 = vmul.f32 %v2167_v52, %v990_v59 }
 0x15a   : > { %2176 = vrcp.f32 %v2588_v60  ;;  %v1237_v15 = vand.u32 2147483647, %v2588_v60  ;;  %v1239_v19 = vand.u32 2147483648, %v2588_v60  ;;  %vm1233_vm7 = vweird.f32 %v2588_v60 }
 0x15b   : > { %v2171_v2 = vpop.eup %2170  ;;  %v1954_v3 = vmul.f32 -1.442695, %v788_v0  ;;  %v992_v4 = vadd.f32 %v2167_v52, %v991_v1 }
 0x15c   : > { %v2173_v5 = vpop.eup %2172  ;;  %v2592_v6 = vadd.f32 1.0, %v2171_v2  ;;  %v825_v7 = vpop.f32.mrf.mxu3  ;;  %vm2612_vm8 = vcmp.eq.f32.partialorder %v1237_v15, 8.507059e+37  ;;  %v1240_v33 = vor.u32 1.1754944e-38, %v1239_v19 }
 0x15d   : > { %2178 = vpow2.f32 %v1954_v3  ;;  %v826_v10 = vadd.f32 %v825_v7, %v2578_v35  ;;  %v996_v11 = vsel %vm995_vm2, %v2167_v52, %v992_v4  ;;  %v1004_v12 = vmul.f32 %v2173_v5, %v2584_v53 }
 0x15e   : > { %2180 = vrcp.f32 %v2592_v6  ;;  %v1001_v13 = vsel %vm998_vm3, %v1000_v8, %v996_v11  ;;  %vm1009_vm5 = vweird.f32 %v2173_v5  ;;  %vm1023_vm11 = vweird.f32 %v2592_v6 }
 0x15f   : > { %v2175_v16 = vpop.eup %2174  ;;  %v1969_v17 = vmul.f32 -1.442695, %v826_v10  ;;  %1502 = vperm.xlu0 %2158, %v1001_v13   ;;  %v1005_v18 = vsub.f32 1.0, %v1004_v12  ;;  %vm1010_vm9 = vmor %vm1008_vm4, %vm1009_vm5  ;;  %v1027_v40 = vand.u32 2147483647, %v2592_v6  ;;  %v1029_v45 = vand.u32 2147483648, %v2592_v6 }
 0x160   : > { %v2177_v20 = vpop.eup %2176  ;;  %v2601_v21 = vadd.f32 1.0, %v2175_v16  ;;  %v790_v22 = vpop.f32.mrf.mxu1 }
 0x161   : > { %2182 = vpow2.f32 %v1969_v17  ;;  %v791_v24 = vadd.f32 %v790_v22, %v2578_v35  ;;  %v1006_v25 = vmul.f32 %v2173_v5, %v1005_v18  ;;  %v1229_v26 = vmul.f32 %v2177_v20, %v2588_v60 }
 0x162   : > { %2184 = vrcp.f32 %v2601_v21  ;;  %vm1234_vm10 = vweird.f32 %v2177_v20  ;;  %v1252_v39 = vand.u32 2147483647, %v2601_v21  ;;  %vm1248_vm12 = vweird.f32 %v2601_v21 }
 0x163   : > { %v2179_v29 = vpop.eup %2178  ;;  %v1955_v30 = vmul.f32 -1.442695, %v791_v24  ;;  %v1007_v31 = vadd.f32 %v2173_v5, %v1006_v25  ;;  %v1230_v32 = vsub.f32 1.0, %v1229_v26  ;;  %v1254_v49 = vand.u32 2147483648, %v2601_v21  ;;  %vm1235_vm13 = vmor %vm1233_vm7, %vm1234_vm10 }
 0x164   : > { %v2616_v34 = vpop.eup %2180  ;;  %v2618_v36 = vadd.f32 1.0, %v2179_v29  ;;  %v827_v38 = vpop.f32.mrf.mxu3  ;;  %vm2641_vm15 = vcmp.eq.f32.partialorder %v1027_v40, 8.507059e+37  ;;  %vm2647_vm0 = vcmp.eq.f32.partialorder %v1252_v39, 8.507059e+37  ;;  %v1030_v1 = vor.u32 1.1754944e-38, %v1029_v45 }
 0x165   : > { %2186 = vpow2.f32 %v1955_v30  ;;  %v828_v41 = vadd.f32 %v827_v38, %v2578_v35  ;;  %v1011_v37 = vsel %vm1010_vm9, %v2173_v5, %v1007_v31  ;;  %v1231_v42 = vmul.f32 %v2177_v20, %v1230_v32 }
 0x166   : > { %2188 = vrcp.f32 %v2618_v36  ;;  %v1016_v43 = vsel %vm2604_vm6, %v1015_v27, %v1011_v37  ;;  %v1019_v44 = vmul.f32 %v2616_v34, %v2592_v6  ;;  %vm1024_vm14 = vweird.f32 %v2616_v34 }
 0x167   : > { %v2183_v46 = vpop.eup %2182  ;;  %v1970_v47 = vmul.f32 -1.442695, %v828_v41  ;;  %1507 = vperm.xlu0 %2158, %v1016_v43   ;;  %v1232_v48 = vadd.f32 %v2177_v20, %v1231_v42  ;;  %v1044_v61 = vand.u32 2147483648, %v2618_v36  ;;  %v1042_v2 = vand.u32 2147483647, %v2618_v36  ;;  %vm2667_vm2 = vmor %vm1023_vm11, %vm1024_vm14 }
 0x168   : > { %v2185_v50 = vpop.eup %2184  ;;  %v2635_v51 = vadd.f32 1.0, %v2183_v46  ;;  %v792_v52 = vpop.f32.mrf.mxu1  ;;  %v1020_v53 = vsub.f32 1.0, %v1019_v44  ;;  %v1255_v7 = vor.u32 1.1754944e-38, %v1254_v49  ;;  %vm1038_vm3 = vweird.f32 %v2618_v36 }
 0x169   : > { %2190 = vpow2.f32 %v1970_v47  ;;  %v793_v55 = vadd.f32 %v792_v52, %v2578_v35  ;;  %v1236_v56 = vsel %vm1235_vm13, %v2177_v20, %v1232_v48  ;;  %v1244_v57 = vmul.f32 %v2185_v50, %v2601_v21 }
 0x16a   : > { %2192 = vrcp.f32 %v2635_v51  ;;  %v1241_v59 = vsel %vm2612_vm8, %v1240_v33, %v1236_v56  ;;  %v1021_v60 = vmul.f32 %v2616_v34, %v1020_v53  ;;  %vm1249_vm1 = vweird.f32 %v2185_v50 }
 0x16b   : > { %v2187_v62 = vpop.eup %2186  ;;  %v1956_v63 = vmul.f32 -1.442695, %v793_v55  ;;  %1582 = vperm.xlu1 %2159, %v1241_v59   ;;  %v1245_v0 = vsub.f32 1.0, %v1244_v57  ;;  %v1045_v14 = vor.u32 1.1754944e-38, %v1044_v61  ;;  %vm2678_vm4 = vcmp.eq.f32.partialorder %v1042_v2, 8.507059e+37  ;;  %vm1250_vm5 = vmor %vm1248_vm12, %vm1249_vm1 }
 0x16c   : > { %v2657_v3 = vpop.eup %2188  ;;  %v2659_v4 = vadd.f32 1.0, %v2187_v62  ;;  %v830_v5 = vpop.f32.mrf.mxu3  ;;  %v1022_v8 = vadd.f32 %v2616_v34, %v1021_v60  ;;  %v1267_v19 = vand.u32 2147483647, %v2635_v51  ;;  %vm1263_vm7 = vweird.f32 %v2635_v51 }
 0x16d   : > { %2194 = vpow2.f32 %v1956_v63  ;;  %v831_v9 = vadd.f32 %v830_v5, %v2578_v35  ;;  %v1246_v10 = vmul.f32 %v2185_v50, %v1245_v0  ;;  %v1034_v12 = vmul.f32 %v2657_v3, %v2618_v36 }
 0x16e   : > { %2196 = vrcp.f32 %v2659_v4  ;;  %v1026_v13 = vsel %vm2667_vm2, %v2616_v34, %v1022_v8  ;;  %vm1039_vm6 = vweird.f32 %v2657_v3  ;;  %v1269_v29 = vand.u32 2147483648, %v2635_v51 }
 0x16f   : > { %v2191_v15 = vpop.eup %2190  ;;  %v1971_v16 = vmul.f32 -1.442695, %v831_v9  ;;  %v1247_v17 = vadd.f32 %v2185_v50, %v1246_v10  ;;  %v1035_v6 = vsub.f32 1.0, %v1034_v12  ;;  %v1031_v24 = vsel %vm2641_vm15, %v1030_v1, %v1026_v13  ;;  %vm2711_vm9 = vmor %vm1038_vm3, %vm1039_vm6 }
 0x170   : > { %v2193_v20 = vpop.eup %2192  ;;  %v2683_v22 = vadd.f32 1.0, %v2191_v15  ;;  %v795_v23 = vpop.f32.mrf.mxu1  ;;  %vm2700_vm8 = vcmp.eq.f32.partialorder %v1267_v19, 8.507059e+37  ;;  %v1057_v34 = vand.u32 2147483647, %v2659_v4  ;;  %vm1053_vm11 = vweird.f32 %v2659_v4 }
 0x171   : > { %2198 = vpow2.f32 %v1971_v16  ;;  %v796_v25 = vadd.f32 %v795_v23, %v2578_v35  ;;  %v1251_v26 = vsel %vm1250_vm5, %v2185_v50, %v1247_v17  ;;  %v1036_v27 = vmul.f32 %v2657_v3, %v1035_v6 }
 0x172   : > { %2200 = vrcp.f32 %v2683_v22  ;;  %v1256_v28 = vsel %vm2647_vm0, %v1255_v7, %v1251_v26  ;;  %v1259_v21 = vmul.f32 %v2193_v20, %v2635_v51  ;;  %vm1264_vm10 = vweird.f32 %v2193_v20 }
 0x173   : > { %v2195_v30 = vpop.eup %2194  ;;  %v1957_v31 = vmul.f32 -1.442695, %v796_v25  ;;  %1587 = vperm.xlu2 %2160, %v1256_v28   ;;  %1512 = vperm.xlu1 %2159, %v1031_v24   ;;  %v1037_v32 = vadd.f32 %v2657_v3, %v1036_v27  ;;  %v1270_v45 = vor.u32 1.1754944e-38, %v1269_v29  ;;  %v1059_v46 = vand.u32 2147483648, %v2659_v4  ;;  %vm1265_vm15 = vmor %vm1263_vm7, %vm1264_vm10 }
 0x174   : > { %v2197_v38 = vpop.eup %2196  ;;  %v2705_v39 = vadd.f32 1.0, %v2195_v30  ;;  %v832_v40 = vpop.f32.mrf.mxu3  ;;  %v1260_v37 = vsub.f32 1.0, %v1259_v21  ;;  %vm2723_vm12 = vcmp.eq.f32.partialorder %v1057_v34, 8.507059e+37  ;;  %vm1278_vm13 = vweird.f32 %v2683_v22 }
 0x175   : > { %2202 = vpow2.f32 %v1957_v31  ;;  %v833_v42 = vadd.f32 %v832_v40, %v2578_v35  ;;  %v1041_v43 = vsel %vm2711_vm9, %v2657_v3, %v1037_v32  ;;  %v1049_v44 = vmul.f32 %v2197_v38, %v2659_v4 }
 0x176   : > { %2204 = vrcp.f32 %v2705_v39  ;;  %v1261_v36 = vmul.f32 %v2193_v20, %v1260_v37  ;;  %v1046_v55 = vsel %vm2678_vm4, %v1045_v14, %v1041_v43  ;;  %vm1054_vm14 = vweird.f32 %v2197_v38 }
 0x177   : > { %v2199_v47 = vpop.eup %2198  ;;  %v1972_v48 = vmul.f32 -1.442695, %v833_v42  ;;  %v1050_v49 = vsub.f32 1.0, %v1049_v44  ;;  %v1060_v61 = vor.u32 1.1754944e-38, %v1059_v46  ;;  %v1282_v62 = vand.u32 2147483647, %v2683_v22  ;;  %vm1055_vm0 = vmor %vm1053_vm11, %vm1054_vm14 }
 0x178   : > { %v2201_v52 = vpop.eup %2200  ;;  %v2728_v53 = vadd.f32 1.0, %v2199_v47  ;;  %v797_v54 = vpop.f32.mrf.mxu1  ;;  %v1262_v56 = vadd.f32 %v2193_v20, %v1261_v36  ;;  %v1284_v8 = vand.u32 2147483648, %v2683_v22  ;;  %vm1068_vm2 = vweird.f32 %v2705_v39 }
 0x179   : > { %2206 = vpow2.f32 %v1972_v48  ;;  %v798_v57 = vadd.f32 %v797_v54, %v2578_v35  ;;  %v1051_v58 = vmul.f32 %v2197_v38, %v1050_v49  ;;  %v1274_v59 = vmul.f32 %v2201_v52, %v2683_v22 }
 0x17a   : > { %2208 = vrcp.f32 %v2728_v53  ;;  %v1266_v60 = vsel %vm1265_vm15, %v2193_v20, %v1262_v56  ;;  %vm1279_vm1 = vweird.f32 %v2201_v52  ;;  %vm2752_vm3 = vcmp.eq.f32.partialorder %v1282_v62, 8.507059e+37 }
 0x17b   : > { %v2203_v63 = vpop.eup %2202  ;;  %v1958_v0 = vmul.f32 -1.442695, %v798_v57  ;;  %1517 = vperm.xlu1 %2159, %v1046_v55   ;;  %v1271_v1 = vsel %vm2700_vm8, %v1270_v45, %v1266_v60  ;;  %v1052_v2 = vadd.f32 %v2197_v38, %v1051_v58  ;;  %v1275_v3 = vsub.f32 1.0, %v1274_v59  ;;  %vm1280_vm4 = vmor %vm1278_vm13, %vm1279_vm1 }
 0x17c   : > { %v2205_v5 = vpop.eup %2204  ;;  %v2741_v51 = vadd.f32 1.0, %v2203_v63  ;;  %1592 = vperm.xlu0 %2158, %v1271_v1   ;;  %v835_v7 = vpop.f32.mrf.mxu3  ;;  %v1072_v17 = vand.u32 2147483647, %v2705_v39  ;;  %v1074_v6 = vand.u32 2147483648, %v2705_v39  ;;  %v1285_v23 = vor.u32 1.1754944e-38, %v1284_v8 }
 0x17d   : > { %2210 = vpow2.f32 %v1958_v0  ;;  %v836_v9 = vadd.f32 %v835_v7, %v2578_v35  ;;  %v1056_v10 = vsel %vm1055_vm0, %v2197_v38, %v1052_v2  ;;  %v1276_v11 = vmul.f32 %v2201_v52, %v1275_v3 }
 0x17e   : > { %2212 = vrcp.f32 %v2741_v51  ;;  %v1061_v12 = vsel %vm2723_vm12, %v1060_v61, %v1056_v10  ;;  %v1064_v4 = vmul.f32 %v2205_v5, %v2705_v39  ;;  %v1297_v25 = vand.u32 2147483647, %v2728_v53 }
 0x17f   : > { %v2207_v14 = vpop.eup %2206  ;;  %v1973_v15 = vmul.f32 -1.442695, %v836_v9  ;;  %1522 = vperm.xlu2 %2160, %v1061_v12   ;;  %v1277_v16 = vadd.f32 %v2201_v52, %v1276_v11  ;;  %vm1069_vm5 = vweird.f32 %v2205_v5  ;;  %vm2773_vm6 = vcmp.eq.f32.partialorder %v1072_v17, 8.507059e+37 }
 0x180   : > { %v2759_v18 = vpop.eup %2208  ;;  %v2761_v19 = vadd.f32 1.0, %v2207_v14  ;;  %v800_v20 = vpop.f32.mrf.mxu1  ;;  %v1065_v24 = vsub.f32 1.0, %v1064_v4  ;;  %v1075_v32 = vor.u32 1.1754944e-38, %v1074_v6  ;;  %vm1293_vm7 = vweird.f32 %v2728_v53  ;;  %vm1070_vm9 = vmor %vm1068_vm2, %vm1069_vm5 }
 0x181   : > { %2214 = vpow2.f32 %v1973_v15  ;;  %v801_v26 = vadd.f32 %v800_v20, %v2578_v35  ;;  %v1281_v27 = vsel %vm1280_vm4, %v2201_v52, %v1277_v16  ;;  %v1289_v28 = vmul.f32 %v2759_v18, %v2728_v53 }
 0x182   : > { %2216 = vrcp.f32 %v2761_v19  ;;  %v1286_v21 = vsel %vm2752_vm3, %v1285_v23, %v1281_v27  ;;  %v1066_v29 = vmul.f32 %v2205_v5, %v1065_v24  ;;  %vm1294_vm8 = vweird.f32 %v2759_v18 }
 0x183   : > { %v2211_v22 = vpop.eup %2210  ;;  %v1959_v30 = vmul.f32 -1.442695, %v801_v26  ;;  %1597 = vperm.xlu1 %2159, %v1286_v21   ;;  %v1290_v33 = vsub.f32 1.0, %v1289_v28  ;;  %vm2786_vm10 = vcmp.eq.f32.partialorder %v1297_v25, 8.507059e+37  ;;  %v1299_v36 = vand.u32 2147483648, %v2728_v53  ;;  %vm2805_vm11 = vmor %vm1293_vm7, %vm1294_vm8 }
 0x184   : > { %v2213_v34 = vpop.eup %2212  ;;  %v2777_v38 = vadd.f32 1.0, %v2211_v22  ;;  %v837_v40 = vpop.f32.mrf.mxu3  ;;  %v1067_v41 = vadd.f32 %v2205_v5, %v1066_v29  ;;  %v1087_v49 = vand.u32 2147483647, %v2741_v51  ;;  %vm1083_vm12 = vweird.f32 %v2741_v51 }
 0x185   : > { %2218 = vpow2.f32 %v1959_v30  ;;  %v838_v37 = vadd.f32 %v837_v40, %v2578_v35  ;;  %v1291_v42 = vmul.f32 %v2759_v18, %v1290_v33  ;;  %v1079_v45 = vmul.f32 %v2213_v34, %v2741_v51 }
 0x186   : > { %2220 = vrcp.f32 %v2777_v38  ;;  %v1071_v44 = vsel %vm1070_vm9, %v2205_v5, %v1067_v41  ;;  %v1089_v57 = vand.u32 2147483648, %v2741_v51  ;;  %v1102_v60 = vand.u32 2147483647, %v2777_v38 }
 0x187   : > { %v2215_v46 = vpop.eup %2214  ;;  %v1974_v47 = vmul.f32 -1.442695, %v838_v37  ;;  %v1076_v48 = vsel %vm2773_vm6, %v1075_v32, %v1071_v44  ;;  %v1292_v39 = vadd.f32 %v2759_v18, %v1291_v42  ;;  %v1080_v56 = vsub.f32 1.0, %v1079_v45 }
 0x188   : > { %v2797_v50 = vpop.eup %2216  ;;  %v2799_v52 = vadd.f32 1.0, %v2215_v46  ;;  %1527 = vperm.xlu2 %2160, %v1076_v48   ;;  %v802_v54 = vpop.f32.mrf.mxu1  ;;  %v1300_v53 = vor.u32 1.1754944e-38, %v1299_v36  ;;  %vm1084_vm13 = vweird.f32 %v2213_v34  ;;  %vm2817_vm14 = vcmp.eq.f32.partialorder %v1087_v49, 8.507059e+37 }
 0x189   : > { %2222 = vpow2.f32 %v1974_v47  ;;  %v803_v58 = vadd.f32 %v802_v54, %v2578_v35  ;;  %v1296_v59 = vsel %vm2805_vm11, %v2759_v18, %v1292_v39  ;;  %v1081_v61 = vmul.f32 %v2213_v34, %v1080_v56  ;;  %vm1085_vm0 = vmor %vm1083_vm12, %vm1084_vm13 }
 0x18a   : > { %2224 = vrcp.f32 %v2799_v52  ;;  %vm1098_vm15 = vweird.f32 %v2777_v38  ;;  %v1304_v1 = vmul.f32 %v2797_v50, %v2761_v19  ;;  %v1301_v7 = vsel %vm2786_vm10, %v1300_v53, %v1296_v59 }
 0x18b   : > { %v2219_v62 = vpop.eup %2218  ;;  %v1960_v63 = vmul.f32 -1.442695, %v803_v58  ;;  %v1082_v8 = vadd.f32 %v2213_v34, %v1081_v61  ;;  %v1090_v9 = vor.u32 1.1754944e-38, %v1089_v57  ;;  %vm2832_vm1 = vcmp.eq.f32.partialorder %v1102_v60, 8.507059e+37 }
 0x18c   : > { %v2221_v2 = vpop.eup %2220  ;;  %v2824_v3 = vadd.f32 1.0, %v2219_v62  ;;  %v840_v5 = vpop.f32.mrf.mxu3  ;;  %v1104_v13 = vand.u32 2147483648, %v2777_v38  ;;  %v1305_v14 = vsub.f32 1.0, %v1304_v1  ;;  %vm1308_vm2 = vweird.f32 %v2761_v19 }
 0x18d   : > { %2226 = vpow2.f32 %v1960_v63  ;;  %v841_v10 = vadd.f32 %v840_v5, %v2578_v35  ;;  %v1094_v11 = vmul.f32 %v2221_v2, %v2777_v38  ;;  %v1086_v4 = vsel %vm1085_vm0, %v2213_v34, %v1082_v8 }
 0x18e   : > { %2228 = vrcp.f32 %v2824_v3  ;;  %v1091_v51 = vsel %vm2817_vm14, %v1090_v9, %v1086_v4  ;;  %v1312_v6 = vand.u32 2147483647, %v2761_v19  ;;  %v1306_v24 = vmul.f32 %v2797_v50, %v1305_v14 }
 0x18f   : > { %v2223_v15 = vpop.eup %2222  ;;  %v1975_v16 = vmul.f32 -1.442695, %v841_v10  ;;  %v1095_v17 = vsub.f32 1.0, %v1094_v11  ;;  %1532 = vperm.xlu0 %2158, %v1091_v51   ;;  %vm1309_vm3 = vweird.f32 %v2797_v50  ;;  %v1314_v25 = vand.u32 2147483648, %v2761_v19 }
 0x190   : > { %v2842_v18 = vpop.eup %2224  ;;  %v2844_v20 = vadd.f32 1.0, %v2223_v15  ;;  %1602 = vperm.xlu2 %2160, %v1301_v7   ;;  %v805_v23 = vpop.f32.mrf.mxu1  ;;  %vm1099_vm4 = vweird.f32 %v2221_v2  ;;  %v1105_v28 = vor.u32 1.1754944e-38, %v1104_v13  ;;  %v1307_v21 = vadd.f32 %v2797_v50, %v1306_v24  ;;  %vm2855_vm5 = vmor %vm1308_vm2, %vm1309_vm3 }
 0x191   : > { %2230 = vpow2.f32 %v1975_v16  ;;  %v806_v26 = vadd.f32 %v805_v23, %v2578_v35  ;;  %v1096_v27 = vmul.f32 %v2221_v2, %v1095_v17  ;;  %v1117_v29 = vand.u32 2147483647, %v2824_v3  ;;  %vm1100_vm7 = vmor %vm1098_vm15, %vm1099_vm4 }
 0x192   : > { %2232 = vrcp.f32 %v2844_v20  ;;  %vm2859_vm6 = vcmp.eq.f32.partialorder %v1312_v6, 8.507059e+37  ;;  %v1319_v34 = vmul.f32 %v2842_v18, %v2799_v52  ;;  %v1311_v19 = vsel %vm2855_vm5, %v2797_v50, %v1307_v21 }
 0x193   : > { %v2227_v22 = vpop.eup %2226  ;;  %v1961_v30 = vmul.f32 -1.442695, %v806_v26  ;;  %v1097_v31 = vadd.f32 %v2221_v2, %v1096_v27  ;;  %v1315_v42 = vor.u32 1.1754944e-38, %v1314_v25  ;;  %vm1113_vm8 = vweird.f32 %v2824_v3 }
 0x194   : > { %v2865_v40 = vpop.eup %2228  ;;  %v2867_v41 = vadd.f32 1.0, %v2227_v22  ;;  %v842_v37 = vpop.f32.mrf.mxu3  ;;  %v1119_v43 = vand.u32 2147483648, %v2824_v3  ;;  %vm1323_vm9 = vweird.f32 %v2799_v52  ;;  %vm2885_vm10 = vcmp.eq.f32.partialorder %v1117_v29, 8.507059e+37 }
 0x195   : > { %2234 = vpow2.f32 %v1961_v30  ;;  %v843_v44 = vadd.f32 %v842_v37, %v2578_v35  ;;  %v1101_v36 = vsel %vm1100_vm7, %v2221_v2, %v1097_v31  ;;  %v1316_v45 = vsel %vm2859_vm6, %v1315_v42, %v1311_v19 }
 0x196   : > { %2236 = vrcp.f32 %v2867_v41  ;;  %v1106_v38 = vsel %vm2832_vm1, %v1105_v28, %v1101_v36  ;;  %v1109_v46 = vmul.f32 %v2865_v40, %v2824_v3  ;;  %vm1114_vm11 = vweird.f32 %v2865_v40 }
 0x197   : > { %v2231_v48 = vpop.eup %2230  ;;  %v1976_v39 = vmul.f32 -1.442695, %v843_v44  ;;  %1537 = vperm.xlu1 %2159, %v1106_v38   ;;  %v1320_v49 = vsub.f32 1.0, %v1319_v34  ;;  %vm1324_vm12 = vweird.f32 %v2842_v18  ;;  %1607 = vperm.xlu0 %2158, %v1316_v45   ;;  %v1327_v57 = vand.u32 2147483647, %v2799_v52  ;;  %vm1115_vm0 = vmor %vm1113_vm8, %vm1114_vm11 }
 0x198   : > { %v2891_v50 = vpop.eup %2232  ;;  %v2893_v54 = vadd.f32 1.0, %v2231_v48  ;;  %v807_v55 = vpop.f32.mrf.mxu1  ;;  %v1110_v56 = vsub.f32 1.0, %v1109_v46  ;;  %v1329_v58 = vand.u32 2147483648, %v2799_v52  ;;  %v1120_v62 = vor.u32 1.1754944e-38, %v1119_v43  ;;  %vm1325_vm14 = vmor %vm1323_vm9, %vm1324_vm12 }
 0x199   : > { %2238 = vpow2.f32 %v1976_v39  ;;  %v808_v59 = vadd.f32 %v807_v55, %v2578_v35  ;;  %v1321_v60 = vmul.f32 %v2842_v18, %v1320_v49  ;;  %v1334_v53 = vmul.f32 %v2891_v50, %v2844_v20 }
 0x19a   : > { %2240 = vrcp.f32 %v2893_v54  ;;  %v1111_v61 = vmul.f32 %v2865_v40, %v1110_v56  ;;  %vm2903_vm13 = vcmp.eq.f32.partialorder %v1327_v57, 8.507059e+37  ;;  %v1330_v5 = vor.u32 1.1754944e-38, %v1329_v58 }
 0x19b   : > { %v2235_v0 = vpop.eup %2234  ;;  %v1962_v1 = vmul.f32 -1.442695, %v808_v59  ;;  %v1322_v2 = vadd.f32 %v2842_v18, %v1321_v60  ;;  %v1335_v7 = vsub.f32 1.0, %v1334_v53  ;;  %vm1339_vm15 = vweird.f32 %v2891_v50 }
 0x19c   : > { %v2908_v8 = vpop.eup %2236  ;;  %v2910_v9 = vadd.f32 1.0, %v2235_v0  ;;  %v845_v10 = vpop.f32.mrf.mxu3  ;;  %v1112_v11 = vadd.f32 %v2865_v40, %v1111_v61  ;;  %v1342_v12 = vand.u32 2147483647, %v2844_v20  ;;  %vm1338_vm1 = vweird.f32 %v2844_v20 }
 0x19d   : > { %2242 = vpow2.f32 %v1962_v1  ;;  %v846_v13 = vadd.f32 %v845_v10, %v2578_v35  ;;  %v1326_v4 = vsel %vm1325_vm14, %v2842_v18, %v1322_v2  ;;  %v1336_v14 = vmul.f32 %v2891_v50, %v1335_v7  ;;  %vm2941_vm2 = vmor %vm1338_vm1, %vm1339_vm15 }
 0x19e   : > { %2244 = vrcp.f32 %v2910_v9  ;;  %v1116_v52 = vsel %vm1115_vm0, %v2865_v40, %v1112_v11  ;;  %v1331_v15 = vsel %vm2903_vm13, %v1330_v5, %v1326_v4  ;;  %v1344_v6 = vand.u32 2147483648, %v2844_v20 }
 0x19f   : > { %v2239_v16 = vpop.eup %2238  ;;  %v1977_v51 = vmul.f32 -1.442695, %v846_v13  ;;  %v1121_v17 = vsel %vm2885_vm10, %v1120_v62, %v1116_v52  ;;  %1612 = vperm.xlu1 %2159, %v1331_v15   ;;  %v1337_v3 = vadd.f32 %v2891_v50, %v1336_v14  ;;  %vm1343_vm3 = vcmp.eq.f32.partialorder %v1342_v12, 8.507059e+37 }
 0x1a0   : > { %v2935_v18 = vpop.eup %2240  ;;  %v2937_v23 = vadd.f32 1.0, %v2239_v16  ;;  %1542 = vperm.xlu2 %2160, %v1121_v17   ;;  %v810_v24 = vpop.f32.mrf.mxu1  ;;  %v1124_v26 = vmul.f32 %v2908_v8, %v2867_v41  ;;  %vm1128_vm4 = vweird.f32 %v2867_v41  ;;  %v1345_v28 = vor.u32 1.1754944e-38, %v1344_v6 }
 0x1a1   : > { %2246 = vpow2.f32 %v1977_v51  ;;  %v811_v20 = vadd.f32 %v810_v24, %v2578_v35  ;;  %v1341_v27 = vsel %vm2941_vm2, %v2891_v50, %v1337_v3  ;;  %vm1129_vm5 = vweird.f32 %v2908_v8 }
 0x1a2   : > { %v1125_v21 = vsub.f32 1.0, %v1124_v26  ;;  %v1132_v29 = vand.u32 2147483647, %v2867_v41  ;;  %v1134_v22 = vand.u32 2147483648, %v2867_v41  ;;  %2248 = vrcp.f32 %v2937_v23  ;;  %vm1130_vm9 = vmor %vm1128_vm4, %vm1129_vm5 }
 0x1a3   : > { %v2243_v30 = vpop.eup %2242  ;;  %v1963_v31 = vmul.f32 -1.442695, %v811_v20  ;;  %v1346_v32 = vsel %vm1343_vm3, %v1345_v28, %v1341_v27  ;;  %v1147_v33 = vand.u32 2147483647, %v2910_v9  ;;  %vm1143_vm7 = vweird.f32 %v2910_v9 }
 0x1a4   : > { %v2245_v34 = vpop.eup %2244  ;;  %v2957_v40 = vadd.f32 1.0, %v2243_v30  ;;  %v847_v37 = vpop.f32.mrf.mxu3  ;;  %v1126_v19 = vmul.f32 %v2908_v8, %v1125_v21  ;;  %vm2960_vm6 = vcmp.eq.f32.partialorder %v1132_v29, 8.507059e+37  ;;  %v1135_v44 = vor.u32 1.1754944e-38, %v1134_v22 }
 0x1a5   : > { %2250 = vpow2.f32 %v1963_v31  ;;  %v848_v43 = vadd.f32 %v847_v37, %v2578_v35  ;;  %v1139_v36 = vmul.f32 %v2245_v34, %v2910_v9  ;;  %vm1144_vm8 = vweird.f32 %v2245_v34 }
 0x1a6   : > { %2252 = vrcp.f32 %v2957_v40  ;;  %v1127_v38 = vadd.f32 %v2908_v8, %v1126_v19  ;;  %v1149_v45 = vand.u32 2147483648, %v2910_v9  ;;  %vm2974_vm10 = vcmp.eq.f32.partialorder %v1147_v33, 8.507059e+37  ;;  %vm1145_vm14 = vmor %vm1143_vm7, %vm1144_vm8 }
 0x1a7   : > { %v2247_v46 = vpop.eup %2246  ;;  %v1978_v47 = vmul.f32 -1.442695, %v848_v43  ;;  %v1140_v48 = vsub.f32 1.0, %v1139_v36  ;;  %v1349_v49 = vmul.f32 %v2935_v18, %v2893_v54  ;;  %vm1353_vm11 = vweird.f32 %v2893_v54 }
 0x1a8   : > { %v2980_v50 = vadd.f32 1.0, %v2247_v46  ;;  %1617 = vperm.xlu2 %2160, %v1346_v32   ;;  %v1131_v55 = vsel %vm1130_vm9, %v2908_v8, %v1127_v38  ;;  %v812_v56 = vpop.f32.mrf.mxu1  ;;  %v1150_v57 = vor.u32 1.1754944e-38, %v1149_v45  ;;  %v2984_v58 = vpop.eup %2248  ;;  %vm1354_vm12 = vweird.f32 %v2935_v18 }
 0x1a9   : > { %2254 = vpow2.f32 %v1978_v47  ;;  %v1136_v41 = vsel %vm2960_vm6, %v1135_v44, %v1131_v55  ;;  %v813_v59 = vadd.f32 %v812_v56, %v2578_v35  ;;  %v1141_v60 = vmul.f32 %v2245_v34, %v1140_v48  ;;  %vm1355_vm0 = vmor %vm1353_vm11, %vm1354_vm12 }
 0x1aa   : > { %1547 = vperm.xlu0 %2158, %v1136_v41   ;;  %v1350_v53 = vsub.f32 1.0, %v1349_v49  ;;  %v1357_v61 = vand.u32 2147483647, %v2893_v54  ;;  %v1359_v62 = vand.u32 2147483648, %v2893_v54  ;;  %2256 = vrcp.f32 %v2980_v50 }
 0x1ab   : > { %v2251_v63 = vpop.eup %2250  ;;  %v1964_v0 = vmul.f32 -1.442695, %v813_v59  ;;  %v1142_v1 = vadd.f32 %v2245_v34, %v1141_v60  ;;  %vm1158_vm13 = vweird.f32 %v2957_v40  ;;  %v1162_v11 = vand.u32 2147483647, %v2957_v40 }
 0x1ac   : > { %v2253_v2 = vpop.eup %2252  ;;  %v2994_v5 = vadd.f32 1.0, %v2251_v63  ;;  %v850_v7 = vpop.f32.mrf.mxu3  ;;  %v1351_v8 = vmul.f32 %v2935_v18, %v1350_v53  ;;  %vm3000_vm15 = vcmp.eq.f32.partialorder %v1357_v61, 8.507059e+37  ;;  %v1360_v52 = vor.u32 1.1754944e-38, %v1359_v62 }
 0x1ad   : > { %2258 = vpow2.f32 %v1964_v0  ;;  %v851_v12 = vadd.f32 %v850_v7, %v2578_v35  ;;  %v1146_v13 = vsel %vm1145_vm14, %v2245_v34, %v1142_v1  ;;  %v1154_v4 = vmul.f32 %v2253_v2, %v2957_v40 }
 0x1ae   : > { %2260 = vrcp.f32 %v2994_v5  ;;  %v1151_v9 = vsel %vm2974_vm10, %v1150_v57, %v1146_v13  ;;  %v1352_v14 = vadd.f32 %v2935_v18, %v1351_v8  ;;  %vm1159_vm1 = vweird.f32 %v2253_v2 }
 0x1af   : > { %v2255_v15 = vpop.eup %2254  ;;  %v1979_v16 = vmul.f32 -1.442695, %v851_v12  ;;  %1552 = vperm.xlu1 %2159, %v1151_v9   ;;  %v1155_v51 = vsub.f32 1.0, %v1154_v4  ;;  %v1164_v17 = vand.u32 2147483648, %v2957_v40  ;;  %vm3019_vm2 = vcmp.eq.f32.partialorder %v1162_v11, 8.507059e+37  ;;  %vm1160_vm4 = vmor %vm1158_vm13, %vm1159_vm1 }
 0x1b0   : > { %v3016_v3 = vadd.f32 1.0, %v2255_v15  ;;  %v1356_v6 = vsel %vm1355_vm0, %v2935_v18, %v1352_v14  ;;  %v815_v24 = vpop.f32.mrf.mxu1  ;;  %v1364_v26 = vmul.f32 %v2984_v58, %v2937_v23  ;;  %v3025_v20 = vpop.eup %2256  ;;  %vm1368_vm3 = vweird.f32 %v2937_v23 }
 0x1b1   : > { %2262 = vpow2.f32 %v1979_v16  ;;  %v1361_v54 = vsel %vm3000_vm15, %v1360_v52, %v1356_v6  ;;  %v816_v27 = vadd.f32 %v815_v24, %v2578_v35  ;;  %v1156_v28 = vmul.f32 %v2253_v2, %v1155_v51 }
 0x1b2   : > { %2264 = vrcp.f32 %v3016_v3  ;;  %1622 = vperm.xlu0 %2158, %v1361_v54   ;;  %v1165_v18 = vor.u32 1.1754944e-38, %v1164_v17  ;;  %v1365_v21 = vsub.f32 1.0, %v1364_v26  ;;  %v1372_v31 = vand.u32 2147483647, %v2937_v23 }
 0x1b3   : > { %v2259_v29 = vpop.eup %2258  ;;  %v1965_v22 = vmul.f32 -1.442695, %v816_v27  ;;  %v1157_v30 = vadd.f32 %v2253_v2, %v1156_v28  ;;  %v1374_v32 = vand.u32 2147483648, %v2937_v23  ;;  %vm1369_vm5 = vweird.f32 %v2984_v58 }
 0x1b4   : > { %v3034_v33 = vpop.eup %2260  ;;  %v3036_v34 = vadd.f32 1.0, %v2259_v29  ;;  %v852_v37 = vpop.f32.mrf.mxu3  ;;  %v1366_v19 = vmul.f32 %v2984_v58, %v1365_v21  ;;  %v1379_v42 = vmul.f32 %v3025_v20, %v2980_v50  ;;  %vm3046_vm6 = vcmp.eq.f32.partialorder %v1372_v31, 8.507059e+37  ;;  %vm1370_vm7 = vmor %vm1368_vm3, %vm1369_vm5 }
 0x1b5   : > { %2266 = vpow2.f32 %v1965_v22  ;;  %v853_v43 = vadd.f32 %v852_v37, %v2578_v35  ;;  %v1161_v44 = vsel %vm1160_vm4, %v2253_v2, %v1157_v30  ;;  %v1375_v45 = vor.u32 1.1754944e-38, %v1374_v32 }
 0x1b6   : > { %2268 = vrcp.f32 %v3036_v34  ;;  %v1166_v40 = vsel %vm3019_vm2, %v1165_v18, %v1161_v44  ;;  %v1367_v38 = vadd.f32 %v2984_v58, %v1366_v19  ;;  %v1380_v48 = vsub.f32 1.0, %v1379_v42 }
 0x1b7   : > { %v2263_v46 = vpop.eup %2262  ;;  %v1980_v47 = vmul.f32 -1.442695, %v853_v43  ;;  %1557 = vperm.xlu2 %2160, %v1166_v40   ;;  %vm1384_vm8 = vweird.f32 %v3025_v20  ;;  %v1387_v39 = vand.u32 2147483647, %v2980_v50  ;;  %v1389_v41 = vand.u32 2147483648, %v2980_v50  ;;  %v3118_v40 = vld [vmem:[%s2476_s14 + $0x44] sm:$0xff]  }
 0x1b8   : > { %v3058_v49 = vpop.eup %2264  ;;  %v3060_v55 = vadd.f32 1.0, %v2263_v46  ;;  %v1371_v56 = vsel %vm1370_vm7, %v2984_v58, %v1367_v38  ;;  %v817_v57 = vpop.f32.mrf.mxu1  ;;  %v1169_v59 = vmul.f32 %v3034_v33, %v2994_v5  ;;  %v1381_v53 = vmul.f32 %v3025_v20, %v1380_v48 }
 0x1b9   : > { %2270 = vpow2.f32 %v1980_v47  ;;  %v1376_v23 = vsel %vm3046_vm6, %v1375_v45, %v1371_v56  ;;  %v818_v60 = vadd.f32 %v817_v57, %v2578_v35  ;;  %vm1383_vm9 = vweird.f32 %v2980_v50 }
 0x1ba   : > { %2272 = vrcp.f32 %v3060_v55  ;;  %1627 = vperm.xlu1 %2159, %v1376_v23   ;;  %vm3072_vm10 = vcmp.eq.f32.partialorder %v1387_v39, 8.507059e+37  ;;  %v1170_v61 = vsub.f32 1.0, %v1169_v59  ;;  %v1382_v0 = vadd.f32 %v3025_v20, %v1381_v53  ;;  %vm1385_vm12 = vmor %vm1383_vm9, %vm1384_vm8 }
 0x1bb   : > { %v2267_v62 = vpop.eup %2266  ;;  %v1966_v63 = vmul.f32 -1.442695, %v818_v60  ;;  %v1390_v1 = vor.u32 1.1754944e-38, %v1389_v41  ;;  %vm1174_vm11 = vweird.f32 %v3034_v33  ;;  %v1177_v10 = vand.u32 2147483647, %v2994_v5  ;;  %v3141_v60 = vld [vmem:[%s2476_s14] sm:$0xff]  }
 0x1bc   : > { %v2269_v2 = vpop.eup %2268  ;;  %v3078_v7 = vadd.f32 1.0, %v2267_v62  ;;  %v855_v8 = vpop.f32.mrf.mxu3  ;;  %v1171_v50 = vmul.f32 %v3034_v33, %v1170_v61  ;;  %v1179_v11 = vand.u32 2147483648, %v2994_v5  ;;  %v1386_v13 = vsel %vm1385_vm12, %v3025_v20, %v1382_v0 }
 0x1bd   : > { %2274 = vpow2.f32 %v1966_v63  ;;  %v856_v12 = vadd.f32 %v855_v8, %v2578_v35  ;;  %v1184_v4 = vmul.f32 %v2269_v2, %v3036_v34  ;;  %v1391_v9 = vsel %vm3072_vm10, %v1390_v1, %v1386_v13 }
 0x1be   : > { %2276 = vrcp.f32 %v3078_v7  ;;  %v1172_v14 = vadd.f32 %v3034_v33, %v1171_v50  ;;  %vm1173_vm13 = vweird.f32 %v2994_v5  ;;  %vm1178_vm15 = vcmp.eq.f32.partialorder %v1177_v10, 8.507059e+37 }
 0x1bf   : > { %v2271_v52 = vpop.eup %2270  ;;  %v1981_v15 = vmul.f32 -1.442695, %v856_v12  ;;  %1632 = vperm.xlu2 %2160, %v1391_v9   ;;  %vm1175_vm14 = vmor %vm1173_vm13, %vm1174_vm11  ;;  %v1180_v16 = vor.u32 1.1754944e-38, %v1179_v11  ;;  %v1185_v51 = vsub.f32 1.0, %v1184_v4  ;;  %vm1189_vm0 = vweird.f32 %v2269_v2 }
 0x1c0   : > { %v3095_v17 = vpop.eup %2272  ;;  %v3097_v6 = vadd.f32 1.0, %v2271_v52  ;;  %v1176_v24 = vsel %vm1175_vm14, %v3034_v33, %v1172_v14  ;;  %v1192_v25 = vand.u32 2147483647, %v3036_v34  ;;  %v1194_v20 = vand.u32 2147483648, %v3036_v34 }
 0x1c1   : > { %2278 = vpow2.f32 %v1981_v15  ;;  %v1181_v5 = vsel %vm1178_vm15, %v1180_v16, %v1176_v24  ;;  %v1186_v26 = vmul.f32 %v2269_v2, %v1185_v51  ;;  %v1394_v54 = vmul.f32 %v3058_v49, %v3016_v3 }
 0x1c2   : > { %1562 = vperm.xlu0 %2158, %v1181_v5   ;;  %2280 = vrcp.f32 %v3097_v6  ;;  %vm1188_vm1 = vweird.f32 %v3036_v34  ;;  %vm1193_vm2 = vcmp.eq.f32.partialorder %v1192_v25, 8.507059e+37  ;;  %v1195_v22 = vor.u32 1.1754944e-38, %v1194_v20  ;;  %v3167_v5 = vld [vmem:[%s2476_s14 + $0x10] sm:$0xff]  }
 0x1c3   : > { %v2275_v27 = vpop.eup %2274  ;;  %v1187_v28 = vadd.f32 %v2269_v2, %v1186_v26  ;;  %vm1190_vm3 = vmor %vm1188_vm1, %vm1189_vm0  ;;  %v1395_v30 = vsub.f32 1.0, %v1394_v54  ;;  %v1404_v31 = vand.u32 2147483648, %v3016_v3  ;;  %vm1398_vm4 = vweird.f32 %v3016_v3 }
 0x1c4   : > { %v2277_v18 = vpop.eup %2276  ;;  %v3106_v21 = vadd.f32 1.0, %v2275_v27  ;;  %v857_v29 = vpop.f32.mrf.mxu3  ;;  %vm1399_vm5 = vweird.f32 %v3058_v49  ;;  %v1402_v42 = vand.u32 2147483647, %v3016_v3  ;;  %v1207_v46 = vand.u32 2147483647, %v3078_v7 }
 0x1c5   : > { %v858_v32 = vadd.f32 %v857_v29, %v2578_v35  ;;  %v1191_v33 = vsel %vm1190_vm3, %v2269_v2, %v1187_v28  ;;  %v1199_v34 = vmul.f32 %v2277_v18, %v3078_v7  ;;  %v1396_v19 = vmul.f32 %v3058_v49, %v1395_v30  ;;  %vm1400_vm6 = vmor %vm1398_vm4, %vm1399_vm5 }
 0x1c6   : > { %v1196_v37 = vsel %vm1193_vm2, %v1195_v22, %v1191_v33  ;;  %2282 = vrcp.f32 %v3106_v21  ;;  %v1405_v36 = vor.u32 1.1754944e-38, %v1404_v31  ;;  %v1209_v47 = vand.u32 2147483648, %v3078_v7  ;;  %v292_v31 = vld [vmem:[%s2476_s14 + $0x40] sm:$0xf] }
 0x1c7   : > { %v2279_v43 = vpop.eup %2278  ;;  %v1982_v44 = vmul.f32 -1.442695, %v858_v32  ;;  %1567 = vperm.xlu1 %2159, %v1196_v37   ;;  %v1200_v35 = vsub.f32 1.0, %v1199_v34  ;;  %v1397_v45 = vadd.f32 %v3058_v49, %v1396_v19  ;;  %vm1204_vm7 = vweird.f32 %v2277_v18 }
 0x1c8   : > { %v3121_v38 = vadd.f32 1.0, %v2279_v43  ;;  %v3126_v48 = vpop.eup %2280  ;;  %v1409_v56 = vmul.f32 %v3095_v17, %v3060_v55  ;;  %vm1403_vm8 = vcmp.eq.f32.partialorder %v1402_v42, 8.507059e+37  ;;  %v1485_v41 = vunpack.c.l.bf16 %v3118_v40 }
 0x1c9   : > { %2284 = vpow2.f32 %v1982_v44  ;;  %v1201_v39 = vmul.f32 %v2277_v18, %v1200_v35  ;;  %v1401_v57 = vsel %vm1400_vm6, %v3058_v49, %v1397_v45  ;;  %vm1203_vm9 = vweird.f32 %v3078_v7 }
 0x1ca   : > { %2286 = vrcp.f32 %v3121_v38  ;;  %v1406_v59 = vsel %vm1403_vm8, %v1405_v36, %v1401_v57  ;;  %v1410_v3 = vsub.f32 1.0, %v1409_v56  ;;  %vm1205_vm10 = vmor %vm1203_vm9, %vm1204_vm7  ;;  %vm1208_vm11 = vcmp.eq.f32.partialorder %v1207_v46, 8.507059e+37 }
 0x1cb   : > { %v1202_v23 = vadd.f32 %v2277_v18, %v1201_v39  ;;  %1637 = vperm.xlu0 %2158, %v1406_v59   ;;  %v1210_v53 = vor.u32 1.1754944e-38, %v1209_v47  ;;  %v1419_v49 = vand.u32 2147483648, %v3060_v55  ;;  %v1424_v58 = vmul.f32 %v3126_v48, %v3097_v6 }
 0x1cc   : > { %v2283_v61 = vpop.eup %2282  ;;  %v1411_v0 = vmul.f32 %v3095_v17, %v1410_v3  ;;  %vm1414_vm12 = vweird.f32 %v3095_v17  ;;  %v1417_v1 = vand.u32 2147483647, %v3060_v55  ;;  %v1468_v8 = vunpack.c.l.bf16 %v3141_v60 }
 0x1cd   : > { %v1588_v62 = vpop.permute.xlu2 %1587  ;;  %v1206_v63 = vsel %vm1205_vm10, %v2277_v18, %v1202_v23  ;;  %vm1413_vm13 = vweird.f32 %v3060_v55  ;;  %v1425_v11 = vsub.f32 1.0, %v1424_v58  ;;  %vm1429_vm14 = vweird.f32 %v3126_v48  ;;  %v278_v58 = vld [vmem:[%s2476_s14 + $0x8] sm:$0xff]  }
 0x1ce   : > { %v1677_v2 = vmul.f32 %v1588_v62, %v1485_v41  ;;  %v1211_v7 = vsel %vm1208_vm11, %v1210_v53, %v1206_v63  ;;  %v1412_v10 = vadd.f32 %v3095_v17, %v1411_v0  ;;  %vm1415_vm15 = vmor %vm1413_vm13, %vm1414_vm12  ;;  %v1420_v13 = vor.u32 1.1754944e-38, %v1419_v49 }
 0x1cf   : > { %v2285_v50 = vpop.eup %2284  ;;  %1572 = vperm.xlu2 %2160, %v1211_v7   ;;  %v1434_v4 = vand.u32 2147483648, %v3097_v6  ;;  %v1214_v9 = vmul.f32 %v2283_v61, %v3106_v21  ;;  %vm1418_vm0 = vcmp.eq.f32.partialorder %v1417_v1, 8.507059e+37  ;;  %v1426_v15 = vmul.f32 %v3126_v48, %v1425_v11 }
 0x1d0   : > { %v3153_v12 = vadd.f32 1.0, %v2285_v50  ;;  %1709 = vst [vmem:[%s3155_s10 + $0x88] sm:$0xff] %v1677_v2  ;;  %v3160_v14 = vpop.eup %2286  ;;  %v1416_v55 = vsel %vm1415_vm15, %v3095_v17, %v1412_v10  ;;  %v1432_v16 = vand.u32 2147483647, %v3097_v6  ;;  %vm1428_vm1 = vweird.f32 %v3097_v6 }
 0x1d1   : > { %v1503_v52 = vpop.permute.xlu0 %1502  ;;  %v1421_v51 = vsel %vm1418_vm0, %v1420_v13, %v1416_v55  ;;  %v1215_v25 = vsub.f32 1.0, %v1214_v9  ;;  %v1427_v26 = vadd.f32 %v3126_v48, %v1426_v15  ;;  %vm1219_vm2 = vweird.f32 %v2283_v61  ;;  %vm1430_vm3 = vmor %vm1428_vm1, %vm1429_vm14 }
 0x1d2   : > { %2288 = vrcp.f32 %v3153_v12  ;;  %v1660_v24 = vmul.f32 %v1503_v52, %v1468_v8  ;;  %1642 = vperm.xlu1 %2159, %v1421_v51   ;;  %v1224_v17 = vand.u32 2147483648, %v3106_v21  ;;  %v1435_v20 = vor.u32 1.1754944e-38, %v1434_v4  ;;  %v296_v8 = vld [vmem:[%s2476_s14 + $0x50] sm:$0xff]  }
 0x1d3   : > { %v1216_v54 = vmul.f32 %v2283_v61, %v1215_v25  ;;  %v1222_v27 = vand.u32 2147483647, %v3106_v21  ;;  %v1439_v28 = vmul.f32 %v3160_v14, %v3121_v38  ;;  %v1431_v18 = vsel %vm1430_vm3, %v3126_v48, %v1427_v26 }
 0x1d4   : > { %1692 = vst [vmem:[%s3155_s10] sm:$0xff] %v1660_v24  ;;  %vm1433_vm4 = vcmp.eq.f32.partialorder %v1432_v16, 8.507059e+37  ;;  %vm1218_vm5 = vweird.f32 %v3106_v21  ;;  %v1472_v6 = vunpack.c.l.bf16 %v3167_v5  ;;  %v1469_v30 = vunpack.c.h.bf16 %v3141_v60  ;;  %v295_v16 = vld [vmem:[%s2476_s14 + $0x4c] sm:$0xf]  ;;  %v284_v24 = vld [vmem:[%s2476_s14 + $0x20] sm:$0xff]  }
 0x1d5   : > { %v1436_v29 = vsel %vm1433_vm4, %v1435_v20, %v1431_v18  ;;  %v1217_v22 = vadd.f32 %v2283_v61, %v1216_v54  ;;  %v1440_v32 = vsub.f32 1.0, %v1439_v28  ;;  %vm1220_vm6 = vmor %vm1218_vm5, %vm1219_vm2  ;;  %v1225_v33 = vor.u32 1.1754944e-38, %v1224_v17  ;;  %v299_v20 = vld [vmem:[%s2476_s14 + $0x5c] sm:$0xff]  }
 0x1d6   : > { %vm1223_vm7 = vcmp.eq.f32.partialorder %v1222_v27, 8.507059e+37  ;;  %v1484_v44 = vunpack.c.l.bf16 %v292_v31  ;;  %vm1444_vm8 = vweird.f32 %v3160_v14  ;;  %v1449_v47 = vand.u32 2147483648, %v3121_v38  ;;  %v282_v54 = vld [vmem:[%s2476_s14 + $0x18] sm:$0xff]  }
 0x1d7   : > { %1647 = vperm.xlu2 %2160, %v1436_v29   ;;  %v1221_v37 = vsel %vm1220_vm6, %v2283_v61, %v1217_v22  ;;  %v1441_v19 = vmul.f32 %v3160_v14, %v1440_v32  ;;  %vm1443_vm9 = vweird.f32 %v3121_v38  ;;  %v1447_v39 = vand.u32 2147483647, %v3121_v38 }
 0x1d8   : > { %v2289_v34 = vpop.eup %2288  ;;  %v1226_v42 = vsel %vm1223_vm7, %v1225_v33, %v1221_v37  ;;  %v1464_v56 = vand.u32 2147483648, %v3153_v12  ;;  %vm3194_vm10 = vmor %vm1443_vm9, %vm1444_vm8  ;;  %v1462_v23 = vand.u32 2147483647, %v3153_v12  ;;  %v1450_v53 = vor.u32 1.1754944e-38, %v1449_v47 }
 0x1d9   : > { %v1523_v21 = vpop.permute.xlu2 %1522  ;;  %v1508_v43 = vpop.permute.xlu0 %1507  ;;  %v1454_v36 = vmul.f32 %v2289_v34, %v3153_v12  ;;  %1577 = vperm.xlu0 %2158, %v1226_v42   ;;  %v1442_v46 = vadd.f32 %v3160_v14, %v1441_v19  ;;  %vm1459_vm11 = vweird.f32 %v2289_v34  ;;  %v1473_v38 = vunpack.c.h.bf16 %v3167_v5  ;;  %v287_v19 = vld [vmem:[%s2476_s14 + $0x2c] sm:$0xff]   ;;  %v298_v42 = vld [vmem:[%s2476_s14 + $0x58] sm:$0xf] }
 0x1da   : > { %v1664_v35 = vmul.f32 %v1523_v21, %v1472_v6  ;;  %v1661_v45 = vmul.f32 %v1508_v43, %v1469_v30  ;;  %vm1458_vm12 = vweird.f32 %v3153_v12  ;;  %vm1448_vm13 = vcmp.eq.f32.partialorder %v1447_v39, 8.507059e+37 }
 0x1db   : > { %v1455_v48 = vsub.f32 1.0, %v1454_v36  ;;  %v1446_v60 = vsel %vm3194_vm10, %v3160_v14, %v1442_v46  ;;  %vm1460_vm14 = vmor %vm1458_vm12, %vm1459_vm11  ;;  %v1465_v61 = vor.u32 1.1754944e-38, %v1464_v56  ;;  %vm1463_vm15 = vcmp.eq.f32.partialorder %v1462_v23, 8.507059e+37  ;;  %v302_v46 = vld [vmem:[%s2476_s14 + $0x68] sm:$0xff]  }
 0x1dc   : > { %1696 = vst [vmem:[%s3155_s10 + $0x20] sm:$0xff] %v1664_v35  ;;  %v1451_v62 = vsel %vm1448_vm13, %v1450_v53, %v1446_v60  ;;  %v1470_v2 = vunpack.c.l.bf16 %v278_v58  ;;  %v1488_v11 = vunpack.c.l.bf16 %v296_v8  ;;  %v1471_v13 = vunpack.c.h.bf16 %v278_v58 }
 0x1dd   : > { %1693 = vst [vmem:[%s3155_s10 + $0x8] sm:$0xff] %v1661_v45  ;;  %v1583_v57 = vpop.permute.xlu1 %1582  ;;  %v1456_v59 = vmul.f32 %v2289_v34, %v1455_v48  ;;  %v1486_v9 = vunpack.c.h.bf16 %v3118_v40  ;;  %v1487_v51 = vunpack.c.l.bf16 %v295_v16  ;;  %v1476_v26 = vunpack.c.l.bf16 %v284_v24 }
 0x1de   : > { %v1676_v3 = vmul.f32 %v1583_v57, %v1484_v44  ;;  %v1491_v27 = vunpack.c.l.bf16 %v299_v20  ;;  %v1474_v28 = vunpack.c.l.bf16 %v282_v54  ;;  %v1475_v30 = vunpack.c.h.bf16 %v282_v54  ;;  %v286_v57 = vld [vmem:[%s2476_s14 + $0x28] sm:$0xf]  ;;  %v307_v54 = vld [vmem:[%s2476_s14 + $0x7c] sm:$0xf] }
 0x1df   : > { %v1457_v49 = vadd.f32 %v2289_v34, %v1456_v59  ;;  %v1489_v31 = vunpack.c.h.bf16 %v296_v8  ;;  %v1479_v21 = vunpack.c.l.bf16 %v287_v19  ;;  %v1490_v43 = vunpack.c.l.bf16 %v298_v42 }
 0x1e0   : > { %1708 = vst [vmem:[%s3155_s10 + $0x80] sm:$0xff] %v1676_v3  ;;  %v1494_v47 = vunpack.c.l.bf16 %v302_v46  ;;  %v1477_v39 = vunpack.c.h.bf16 %v284_v24  ;;  %v1478_v23 = vunpack.c.l.bf16 %v286_v57  ;;  %v1492_v60 = vunpack.c.h.bf16 %v299_v20  ;;  %v304_v24 = vld [vmem:[%s2476_s14 + $0x70] sm:$0xf] }
 0x1e1   : > { %v1461_v63 = vsel %vm1460_vm14, %v2289_v34, %v1457_v49  ;;  %1652 = vperm.xlu0 %2158, %v1451_v62   ;;  %v301_v62 = vld [vmem:[%s2476_s14 + $0x64] sm:$0xf] }
 0x1e2   : > { %v1528_v0 = vpop.permute.xlu2 %1527  ;;  %v1466_v1 = vsel %vm1463_vm15, %v1465_v61, %v1461_v63 }
 0x1e3   : > { %v1665_v7 = vmul.f32 %v1528_v0, %v1473_v38  ;;  %1657 = vperm.xlu1 %2159, %v1466_v1   ;;  %v290_v38 = vld [vmem:[%s2476_s14 + $0x38] sm:$0xff]   ;;  %v1493_v0 = vunpack.c.l.bf16 %v301_v62 }
 0x1e4   : > { %v1482_v61 = vunpack.c.l.bf16 %v290_v38 }
 0x1e5   : > { %1697 = vst [vmem:[%s3155_s10 + $0x28] sm:$0xff] %v1665_v7  ;;  %v1513_v50 = vpop.permute.xlu1 %1512 }
 0x1e6   : > { %v1662_v10 = vmul.f32 %v1513_v50, %v1470_v2  ;;  %v305_v2 = vld [vmem:[%s2476_s14 + $0x74] sm:$0xff]  }
 0x1e7   : > { %v1497_v50 = vunpack.c.l.bf16 %v305_v2 }
 0x1e8   : > { %1694 = vst [vmem:[%s3155_s10 + $0x10] sm:$0xff] %v1662_v10 }
 0x1ea   : > { %v1603_v12 = vpop.permute.xlu2 %1602 }
 0x1eb   : > { %v1680_v4 = vmul.f32 %v1603_v12, %v1488_v11  ;;  %v1480_v11 = vunpack.c.h.bf16 %v287_v19 }
 0x1ed   : > { %1712 = vst [vmem:[%s3155_s10 + $0xa0] sm:$0xff] %v1680_v4  ;;  %v1518_v14 = vpop.permute.xlu1 %1517 }
 0x1ee   : > { %v1663_v55 = vmul.f32 %v1518_v14, %v1471_v13  ;;  %v1593_v52 = vpop.permute.xlu0 %1592  ;;  %v289_v13 = vld [vmem:[%s2476_s14 + $0x34] sm:$0xf]  ;;  %s2304_s14 = sshra.s32 %s1740_s17, 4  ;;  %s2305_s14 = int_to_ptr.hbm [resolvable:$true] %s2304_s14 }
 0x1ef   : > { %v1678_v15 = vmul.f32 %v1593_v52, %v1486_v9  ;;  %v1481_v14 = vunpack.c.l.bf16 %v289_v13  ;;  %s2306_s19 = scalar_lea.hbm %s2305_s14, 256  ;;  %p2311_p0 = scmp.lt.s32.totalorder %s2305_s14, %s3289_s6 }
 0x1f0   : > { %1695 = vst [vmem:[%s3155_s10 + $0x18] sm:$0xff] %v1663_v55  ;;  %p2307_p11 = scmp.ne.s32.totalorder %s2305_s14, %s2306_s19  ;;  %p2312_p1 = scmp.lt.s32.totalorder %s2310_s22, %s2306_s19 }
 0x1f1   : > { %1710 = vst [vmem:[%s3155_s10 + $0x90] sm:$0xff] %v1678_v15  ;;  %v1495_v15 = vunpack.c.h.bf16 %v302_v46 }
 0x1f2   : > { %p2308_p12 = pnand %p2307_p11, %p2433_p5  ;;  %p2313_p2 = por %p2312_p1, %p2311_p0 }
 0x1f4   : > { %p2309_p13 = pneg %p2308_p12 }
 0x1f5   : > { %v1598_v25 = vpop.permute.xlu1 %1597 }
 0x1f6   : > { %v1679_v5 = vmul.f32 %v1598_v25, %v1487_v51  ;;  %v1496_v25 = vunpack.c.l.bf16 %v304_v24  ;;  %p2314_p3 = pnand %p2313_p2, %p2309_p13 }
 0x1f8   : > { %1711 = vst [vmem:[%s3155_s10 + $0x98] sm:$0xff] %v1679_v5 }
 0x1fa   : > { %v1543_v40 = vpop.permute.xlu2 %1542 }
 0x1fb   : > { %v1668_v17 = vmul.f32 %v1543_v40, %v1476_v26  ;;  %v1483_v40 = vunpack.c.h.bf16 %v290_v38 }
 0x1fd   : > { %1700 = vst [vmem:[%s3155_s10 + $0x40] sm:$0xff] %v1668_v17 }
 0x201   : > { %v1533_v6 = vpop.permute.xlu0 %1532 }
 0x202   : > { %v1618_v18 = vpop.permute.xlu2 %1617  ;;  %v1666_v22 = vmul.f32 %v1533_v6, %v1474_v28  ;;  %v1499_v28 = vunpack.c.l.bf16 %v307_v54 }
 0x203   : > { %v1683_v29 = vmul.f32 %v1618_v18, %v1491_v27  ;;  %v1498_v27 = vunpack.c.h.bf16 %v305_v2 }
 0x204   : > { %1698 = vst [vmem:[%s3155_s10 + $0x30] sm:$0xff] %v1666_v22 }
 0x205   : > { %1715 = vst [vmem:[%s3155_s10 + $0xb8] sm:$0xff] %v1683_v29 }
 0x209   : > { %v1538_v32 = vpop.permute.xlu1 %1537  ;;  %v1608_v34 = vpop.permute.xlu0 %1607 }
 0x20a   : > { %v1667_v33 = vmul.f32 %v1538_v32, %v1475_v30  ;;  %v1681_v37 = vmul.f32 %v1608_v34, %v1489_v31 }
 0x20c   : > { %1699 = vst [vmem:[%s3155_s10 + $0x38] sm:$0xff] %v1667_v33 }
 0x20d   : > { %1713 = vst [vmem:[%s3155_s10 + $0xa8] sm:$0xff] %v1681_v37 }
 0x211   : > { %v1558_v44 = vpop.permute.xlu2 %1557  ;;  %v1613_v36 = vpop.permute.xlu1 %1612 }
 0x212   : > { %v1671_v35 = vmul.f32 %v1558_v44, %v1479_v21  ;;  %v1682_v45 = vmul.f32 %v1613_v36, %v1490_v43 }
 0x214   : > { %1703 = vst [vmem:[%s3155_s10 + $0x58] sm:$0xff] %v1671_v35 }
 0x215   : > { %1714 = vst [vmem:[%s3155_s10 + $0xb0] sm:$0xff] %v1682_v45 }
 0x219   : > { %v1633_v48 = vpop.permute.xlu2 %1632 }
 0x21a   : > { %v1686_v56 = vmul.f32 %v1633_v48, %v1494_v47 }
 0x21c   : > { %1718 = vst [vmem:[%s3155_s10 + $0xd0] sm:$0xff] %v1686_v56  ;;  %v1548_v41 = vpop.permute.xlu0 %1547 }
 0x21d   : > { %v1669_v59 = vmul.f32 %v1548_v41, %v1477_v39 }
 0x21f   : > { %1701 = vst [vmem:[%s3155_s10 + $0x48] sm:$0xff] %v1669_v59 }
 0x221   : > { %v1553_v3 = vpop.permute.xlu1 %1552 }
 0x222   : > { %v1670_v53 = vmul.f32 %v1553_v3, %v1478_v23 }
 0x224   : > { %1702 = vst [vmem:[%s3155_s10 + $0x50] sm:$0xff] %v1670_v53  ;;  %v1623_v49 = vpop.permute.xlu0 %1622 }
 0x225   : > { %v1684_v58 = vmul.f32 %v1623_v49, %v1492_v60 }
 0x227   : > { %1716 = vst [vmem:[%s3155_s10 + $0xc0] sm:$0xff] %v1684_v58 }
 0x229   : > { %v1573_v63 = vpop.permute.xlu2 %1572 }
 0x22a   : > { %v1674_v1 = vmul.f32 %v1573_v63, %v1482_v61 }
 0x22c   : > { %1706 = vst [vmem:[%s3155_s10 + $0x70] sm:$0xff] %v1674_v1  ;;  %v1628_v7 = vpop.permute.xlu1 %1627 }
 0x22d   : > { %v1685_v8 = vmul.f32 %v1628_v7, %v1493_v0 }
 0x22f   : > { %1717 = vst [vmem:[%s3155_s10 + $0xc8] sm:$0xff] %v1685_v8 }
 0x231   : > { %v1648_v10 = vpop.permute.xlu2 %1647 }
 0x232   : > { %v1689_v12 = vmul.f32 %v1648_v10, %v1497_v50 }
 0x234   : > { %1721 = vst [vmem:[%s3155_s10 + $0xe8] sm:$0xff] %v1689_v12  ;;  %v1563_v4 = vpop.permute.xlu0 %1562 }
 0x235   : > { %v1672_v9 = vmul.f32 %v1563_v4, %v1480_v11 }
 0x237   : > { %1704 = vst [vmem:[%s3155_s10 + $0x60] sm:$0xff] %v1672_v9 }
 0x239   : > { %v1568_v55 = vpop.permute.xlu1 %1567 }
 0x23a   : > { %v1673_v52 = vmul.f32 %v1568_v55, %v1481_v14 }
 0x23c   : > { %1705 = vst [vmem:[%s3155_s10 + $0x68] sm:$0xff] %v1673_v52 }
 0x23d   : > { %v1638_v16 = vpop.permute.xlu0 %1637 }
 0x23e   : > { %v1687_v51 = vmul.f32 %v1638_v16, %v1495_v15 }
 0x240   : > { %1719 = vst [vmem:[%s3155_s10 + $0xd8] sm:$0xff] %v1687_v51 }
 0x244   : > { %v1643_v5 = vpop.permute.xlu1 %1642 }
 0x245   : > { %v1688_v26 = vmul.f32 %v1643_v5, %v1496_v25 }
 0x247   : > { %1720 = vst [vmem:[%s3155_s10 + $0xe0] sm:$0xff] %v1688_v26 }
 0x24b   : > { %v1578_v17 = vpop.permute.xlu0 %1577 }
 0x24c   : > { %v1675_v20 = vmul.f32 %v1578_v17, %v1483_v40 }
 0x24e   : > { %1707 = vst [vmem:[%s3155_s10 + $0x78] sm:$0xff] %v1675_v20 }
 0x253   : > { %v1653_v18 = vpop.permute.xlu0 %1652 }
 0x254   : > { %v1690_v6 = vmul.f32 %v1653_v18, %v1498_v27 }
 0x255   : > { %v1658_v29 = vpop.permute.xlu1 %1657 }
 0x256   : > { %v1691_v22 = vmul.f32 %v1658_v29, %v1499_v28  ;;  %1722 = vst [vmem:[%s3155_s10 + $0xf0] sm:$0xff] %v1690_v6 }
 0x258   : > { %1723 = vst [vmem:[%s3155_s10 + $0xf8] sm:$0xff] %v1691_v22 }
 0x259   : > { %2317 = shalt.err (!%p2314_p3)
}
 0x25a   : > { %s2355_s30 = smov 128   ;;  %s2356_s29 = smov 8  }
 0x25b   : > { %2116 = dma.vmem_to_hbm [thread:$0]  (%p2433_p5), %s1738_s16, 4096, %s1740_s17, %s1725_s5, %s2355_s30, %s2355_s30, %s2356_s29  }
 0x25c PF: > { %p2122_p4 = scmp.ge.s32.totalorder %s2352_s26, 2  ;;  %s1754_s10 = sand.u32 1, %s2340_s23  }
 0x25d   : > { %s1755_s11 = scalar_lea.sflag [#allocation4], %s1754_s10 }
 0x25e   : > { %p2119_p7 = pnand %p2122_p4, %p2437_p6 }
 0x260   : > { %p2120_p8 = pneg %p2119_p7 }
 0x262   : > { %2335 = dma.done.wait (%p2120_p8), %s1755_s11, 4096  }
 0x263   : > { %2337 = vsyncadd (%p2120_p8), %s1755_s11, 4294963200  ;;  %p17_p9 = scmp.ge.s32.totalorder %s2420_s28, 4   ;;  %s3346_s23 = smov %s2344_s24 }
 0x264   : > { %s3347_s24 = smov %s2348_s25  ;;  %s3348_s25 = smov %s2431_s7 }
 0x265   : > { %s3349_s26 = smov %s2420_s28  ;;  %19 = sbr.rel (!%p17_p9) target bundleno = 5 (0x5), region = 82 }
 0x26a   :  { %1761 = vsyncpa [#allocation4], 1 }
 0x26b   :  { %1763 = vsyncpa [#allocation4 + $0x1], 1 }

</bundles_post_ra>
